<compile_context>
chip_gen: v7x
topology: tpu7x:2x2x1
jax: 0.10.0
libtpu: 0.0.40
codegen_flags: <defaults>
</compile_context>

<pallas_src>
import math

import jax
import jax.numpy as jnp
from jax import lax
from jax.experimental import pallas as pl
from jax.experimental.pallas import tpu as pltpu


def _emission_kernel(xT_ref, uT_ref, w_ref, b_ref, wu_ref, out_ref):
    """Single invocation -- all K HMM states, all T timesteps.

    xT_ref : (D, T)    VMEM  observations, transposed (time on lanes)
    uT_ref : (K, D, L) VMEM  planar-flow u_hat, transposed per state
    w_ref  : (K, L, D) VMEM  planar-flow w per state
    b_ref  : (K, L)    SMEM  planar-flow biases (scalars)
    wu_ref : (K, L)    SMEM  precomputed w . u_hat (scalars, hoisted)
    out_ref: (K, T)    VMEM  emission log p_k(x_t), lane-dense in T
    """
    D, T = xT_ref.shape
    K, _, L = uT_ref.shape
    log2pi_term = -0.5 * D * math.log(2.0 * math.pi)   # compile-time constant

    x = xT_ref[...]                                    # (D, T)

    for k in range(K):                                 # static unroll, K small
        z = x
        det_prod = jnp.ones((1, T), jnp.float32)
        for l in range(L):                             # static unroll, L small
            w_row = w_ref[k, l:l + 1, :]               # (1, D) ref-level load
            u_col = uT_ref[k, :, l:l + 1]              # (D, 1) ref-level load
            bb = b_ref[k, l]                           # scalar from SMEM
            wu = wu_ref[k, l]                          # scalar from SMEM (hoisted)
            # (1, D) @ (D, T) on the MXU -> (1, T)
            lin = jnp.dot(w_row, z, preferred_element_type=jnp.float32) + bb
            act = jnp.tanh(lin)                        # (1, T)  EUP
            z = z + u_col * act                        # (D, T)  broadcast outer-product update
            det_prod = det_prod * (1.0 + (1.0 - act * act) * wu)   # (1, T)
        logdet = jnp.log(jnp.abs(det_prod) + 1e-8)     # single log over L layers
        base_lp = -0.5 * jnp.sum(z * z, axis=0, keepdims=True) + log2pi_term
        out_ref[k:k + 1, :] = base_lp + logdet         # lane-dense (1, T) row store


def emission_logprobs(x, u_hat, w, b):
    """Returns (K, T) emission log-probabilities from a single Pallas call."""
    T, D = x.shape
    K, L, _ = w.shape
    # Hoisted out of the kernel: layout transposes and the x-independent w.u_hat.
    x_t = x.T                                       # (D, T)   time on lanes
    u_t = jnp.transpose(u_hat, (0, 2, 1))           # (K, D, L)
    wu = jnp.sum(w * u_hat, axis=-1)                # (K, L)
    return pl.pallas_call(
        _emission_kernel,
        out_shape=jax.ShapeDtypeStruct((K, T), jnp.float32),
        in_specs=[
            pl.BlockSpec(memory_space=pltpu.MemorySpace.VMEM),   # x^T
            pl.BlockSpec(memory_space=pltpu.MemorySpace.VMEM),   # u_hat^T
            pl.BlockSpec(memory_space=pltpu.MemorySpace.VMEM),   # w
            pl.BlockSpec(memory_space=pltpu.MemorySpace.SMEM),   # b
            pl.BlockSpec(memory_space=pltpu.MemorySpace.SMEM),   # w.u_hat
        ],
        out_specs=pl.BlockSpec(memory_space=pltpu.MemorySpace.VMEM),
    )(x_t, u_t, w, b, wu)


def init_params(key, dim, n_states, flow_length):
    k1, k2, k3, k4 = jax.random.split(key, 4)
    u = 0.1 * jax.random.normal(k1, (n_states, flow_length, dim), jnp.float32)
    w = 0.1 * jax.random.normal(k2, (n_states, flow_length, dim), jnp.float32)
    b = 0.1 * jax.random.normal(k3, (n_states, flow_length), jnp.float32)
    # planar-flow invertibility reparametrization: u_hat = u + (m(w.u) - w.u) w/||w||^2
    wu = jnp.sum(w * u, axis=-1, keepdims=True)
    m = -1.0 + jax.nn.softplus(wu)
    u_hat = u + (m - wu) * w / (jnp.sum(w * w, axis=-1, keepdims=True) + 1e-8)

    trans_logits = jax.random.normal(k4, (n_states, n_states), jnp.float32)
    log_A = jax.nn.log_softmax(trans_logits, axis=-1)         # row-stochastic transitions
    log_pi = jnp.log(jnp.full((n_states,), 1.0 / n_states, jnp.float32))
    return dict(u_hat=u_hat, w=w, b=b, log_A=log_A, log_pi=log_pi)


def main_model_forward(params, x, T):
    """Equivalent of MainModel.forward(x, T): HMM sequence log-likelihood."""
    E = emission_logprobs(x[:T], params["u_hat"], params["w"], params["b"])  # (K, T)
    E_t = E.T                                                                # (T, K)
    log_A, log_pi = params["log_A"], params["log_pi"]

    alpha0 = log_pi + E_t[0]                                                 # (K,)

    def step(alpha, e_t):
        new = jax.nn.logsumexp(alpha[:, None] + log_A, axis=0) + e_t
        return new, None

    alpha, _ = lax.scan(step, alpha0, E_t[1:])
    return jax.nn.logsumexp(alpha)                                           # scalar log p(x_{1:T})


if __name__ == "__main__":
    dim, n_states, flow_length, T = 32, 3, 4, 8

    key = jax.random.PRNGKey(0)
    pkey, xkey = jax.random.split(key)
    params = init_params(pkey, dim, n_states, flow_length)
    x = jax.random.normal(xkey, (T, dim), jnp.float32)

    loglik = main_model_forward(params, x, T)
    jax.block_until_ready(loglik)
    print("KERNEL_OK")
</pallas_src>

<mosaic_0001>
module attributes {stable_mosaic.version = 11 : i64} {
  func.func @_emission_kernel(%arg0: memref<32x8xf32, #tpu.memory_space<vmem>>, %arg1: memref<3x32x4xf32, #tpu.memory_space<vmem>>, %arg2: memref<3x4x32xf32, #tpu.memory_space<vmem>>, %arg3: memref<3x4xf32, #tpu.memory_space<smem>>, %arg4: memref<3x4xf32, #tpu.memory_space<smem>>, %arg5: memref<3x8xf32, #tpu.memory_space<vmem>>) attributes {dimension_semantics = [], scalar_prefetch = 0 : i64, scratch_operands = 0 : i64, tpu.core_type = #tpu.core_type<tc>} {
    %c0 = arith.constant 0 : index
    %c0_0 = arith.constant 0 : index
    %0 = vector.load %arg0[%c0, %c0_0] : memref<32x8xf32, #tpu.memory_space<vmem>>, vector<32x8xf32>
    %cst = arith.constant 1.000000e+00 : f32
    %1 = vector.broadcast %cst : f32 to vector<1x8xf32>
    %c0_1 = arith.constant 0 : index
    %c0_2 = arith.constant 0 : index
    %c0_3 = arith.constant 0 : index
    %2 = vector.load %arg2[%c0_1, %c0_2, %c0_3] : memref<3x4x32xf32, #tpu.memory_space<vmem>>, vector<1x1x32xf32>
    %3 = vector.shape_cast %2 : vector<1x1x32xf32> to vector<1x32xf32>
    %c0_4 = arith.constant 0 : index
    %c0_5 = arith.constant 0 : index
    %c0_6 = arith.constant 0 : index
    %4 = vector.load %arg1[%c0_4, %c0_5, %c0_6] : memref<3x32x4xf32, #tpu.memory_space<vmem>>, vector<1x32x1xf32>
    %5 = vector.shape_cast %4 : vector<1x32x1xf32> to vector<32x1xf32>
    %c0_7 = arith.constant 0 : index
    %c0_8 = arith.constant 0 : index
    %6 = memref.load %arg3[%c0_7, %c0_8] : memref<3x4xf32, #tpu.memory_space<smem>>
    %c0_9 = arith.constant 0 : index
    %c0_10 = arith.constant 0 : index
    %7 = memref.load %arg4[%c0_9, %c0_10] : memref<3x4xf32, #tpu.memory_space<smem>>
    %cst_11 = arith.constant dense<0.000000e+00> : vector<1x8xf32>
    %8 = tpu.matmul %3, %0, %cst_11 {dimension_numbers = #tpu.dot_dimension_numbers<[1], [0], [0], [1], [0, 0, 1, 1], [], []>} : vector<1x32xf32>, vector<32x8xf32>, vector<1x8xf32> -> vector<1x8xf32>
    %9 = vector.broadcast %6 : f32 to vector<1x8xf32>
    %10 = arith.addf %8, %9 : vector<1x8xf32>
    %11 = math.tanh %10 : vector<1x8xf32>
    %12 = vector.broadcast %5 : vector<32x1xf32> to vector<32x8xf32>
    %13 = vector.broadcast %11 : vector<1x8xf32> to vector<32x8xf32>
    %14 = arith.mulf %12, %13 : vector<32x8xf32>
    %15 = arith.addf %0, %14 : vector<32x8xf32>
    %16 = arith.mulf %11, %11 : vector<1x8xf32>
    %cst_12 = arith.constant 1.000000e+00 : f32
    %17 = vector.broadcast %cst_12 : f32 to vector<1x8xf32>
    %18 = arith.subf %17, %16 : vector<1x8xf32>
    %19 = vector.broadcast %7 : f32 to vector<1x8xf32>
    %20 = arith.mulf %18, %19 : vector<1x8xf32>
    %cst_13 = arith.constant 1.000000e+00 : f32
    %21 = vector.broadcast %cst_13 : f32 to vector<1x8xf32>
    %22 = arith.addf %21, %20 : vector<1x8xf32>
    %23 = arith.mulf %1, %22 : vector<1x8xf32>
    %c0_14 = arith.constant 0 : index
    %c1 = arith.constant 1 : index
    %c0_15 = arith.constant 0 : index
    %24 = vector.load %arg2[%c0_14, %c1, %c0_15] : memref<3x4x32xf32, #tpu.memory_space<vmem>>, vector<1x1x32xf32>
    %25 = vector.shape_cast %24 : vector<1x1x32xf32> to vector<1x32xf32>
    %c0_16 = arith.constant 0 : index
    %c0_17 = arith.constant 0 : index
    %c1_18 = arith.constant 1 : index
    %26 = vector.load %arg1[%c0_16, %c0_17, %c1_18] : memref<3x32x4xf32, #tpu.memory_space<vmem>>, vector<1x32x1xf32>
    %27 = vector.shape_cast %26 : vector<1x32x1xf32> to vector<32x1xf32>
    %c0_19 = arith.constant 0 : index
    %c1_20 = arith.constant 1 : index
    %28 = memref.load %arg3[%c0_19, %c1_20] : memref<3x4xf32, #tpu.memory_space<smem>>
    %c0_21 = arith.constant 0 : index
    %c1_22 = arith.constant 1 : index
    %29 = memref.load %arg4[%c0_21, %c1_22] : memref<3x4xf32, #tpu.memory_space<smem>>
    %cst_23 = arith.constant dense<0.000000e+00> : vector<1x8xf32>
    %30 = tpu.matmul %25, %15, %cst_23 {dimension_numbers = #tpu.dot_dimension_numbers<[1], [0], [0], [1], [0, 0, 1, 1], [], []>} : vector<1x32xf32>, vector<32x8xf32>, vector<1x8xf32> -> vector<1x8xf32>
    %31 = vector.broadcast %28 : f32 to vector<1x8xf32>
    %32 = arith.addf %30, %31 : vector<1x8xf32>
    %33 = math.tanh %32 : vector<1x8xf32>
    %34 = vector.broadcast %27 : vector<32x1xf32> to vector<32x8xf32>
    %35 = vector.broadcast %33 : vector<1x8xf32> to vector<32x8xf32>
    %36 = arith.mulf %34, %35 : vector<32x8xf32>
    %37 = arith.addf %15, %36 : vector<32x8xf32>
    %38 = arith.mulf %33, %33 : vector<1x8xf32>
    %cst_24 = arith.constant 1.000000e+00 : f32
    %39 = vector.broadcast %cst_24 : f32 to vector<1x8xf32>
    %40 = arith.subf %39, %38 : vector<1x8xf32>
    %41 = vector.broadcast %29 : f32 to vector<1x8xf32>
    %42 = arith.mulf %40, %41 : vector<1x8xf32>
    %cst_25 = arith.constant 1.000000e+00 : f32
    %43 = vector.broadcast %cst_25 : f32 to vector<1x8xf32>
    %44 = arith.addf %43, %42 : vector<1x8xf32>
    %45 = arith.mulf %23, %44 : vector<1x8xf32>
    %c0_26 = arith.constant 0 : index
    %c2 = arith.constant 2 : index
    %c0_27 = arith.constant 0 : index
    %46 = vector.load %arg2[%c0_26, %c2, %c0_27] : memref<3x4x32xf32, #tpu.memory_space<vmem>>, vector<1x1x32xf32>
    %47 = vector.shape_cast %46 : vector<1x1x32xf32> to vector<1x32xf32>
    %c0_28 = arith.constant 0 : index
    %c0_29 = arith.constant 0 : index
    %c2_30 = arith.constant 2 : index
    %48 = vector.load %arg1[%c0_28, %c0_29, %c2_30] : memref<3x32x4xf32, #tpu.memory_space<vmem>>, vector<1x32x1xf32>
    %49 = vector.shape_cast %48 : vector<1x32x1xf32> to vector<32x1xf32>
    %c0_31 = arith.constant 0 : index
    %c2_32 = arith.constant 2 : index
    %50 = memref.load %arg3[%c0_31, %c2_32] : memref<3x4xf32, #tpu.memory_space<smem>>
    %c0_33 = arith.constant 0 : index
    %c2_34 = arith.constant 2 : index
    %51 = memref.load %arg4[%c0_33, %c2_34] : memref<3x4xf32, #tpu.memory_space<smem>>
    %cst_35 = arith.constant dense<0.000000e+00> : vector<1x8xf32>
    %52 = tpu.matmul %47, %37, %cst_35 {dimension_numbers = #tpu.dot_dimension_numbers<[1], [0], [0], [1], [0, 0, 1, 1], [], []>} : vector<1x32xf32>, vector<32x8xf32>, vector<1x8xf32> -> vector<1x8xf32>
    %53 = vector.broadcast %50 : f32 to vector<1x8xf32>
    %54 = arith.addf %52, %53 : vector<1x8xf32>
    %55 = math.tanh %54 : vector<1x8xf32>
    %56 = vector.broadcast %49 : vector<32x1xf32> to vector<32x8xf32>
    %57 = vector.broadcast %55 : vector<1x8xf32> to vector<32x8xf32>
    %58 = arith.mulf %56, %57 : vector<32x8xf32>
    %59 = arith.addf %37, %58 : vector<32x8xf32>
    %60 = arith.mulf %55, %55 : vector<1x8xf32>
    %cst_36 = arith.constant 1.000000e+00 : f32
    %61 = vector.broadcast %cst_36 : f32 to vector<1x8xf32>
    %62 = arith.subf %61, %60 : vector<1x8xf32>
    %63 = vector.broadcast %51 : f32 to vector<1x8xf32>
    %64 = arith.mulf %62, %63 : vector<1x8xf32>
    %cst_37 = arith.constant 1.000000e+00 : f32
    %65 = vector.broadcast %cst_37 : f32 to vector<1x8xf32>
    %66 = arith.addf %65, %64 : vector<1x8xf32>
    %67 = arith.mulf %45, %66 : vector<1x8xf32>
    %c0_38 = arith.constant 0 : index
    %c3 = arith.constant 3 : index
    %c0_39 = arith.constant 0 : index
    %68 = vector.load %arg2[%c0_38, %c3, %c0_39] : memref<3x4x32xf32, #tpu.memory_space<vmem>>, vector<1x1x32xf32>
    %69 = vector.shape_cast %68 : vector<1x1x32xf32> to vector<1x32xf32>
    %c0_40 = arith.constant 0 : index
    %c0_41 = arith.constant 0 : index
    %c3_42 = arith.constant 3 : index
    %70 = vector.load %arg1[%c0_40, %c0_41, %c3_42] : memref<3x32x4xf32, #tpu.memory_space<vmem>>, vector<1x32x1xf32>
    %71 = vector.shape_cast %70 : vector<1x32x1xf32> to vector<32x1xf32>
    %c0_43 = arith.constant 0 : index
    %c3_44 = arith.constant 3 : index
    %72 = memref.load %arg3[%c0_43, %c3_44] : memref<3x4xf32, #tpu.memory_space<smem>>
    %c0_45 = arith.constant 0 : index
    %c3_46 = arith.constant 3 : index
    %73 = memref.load %arg4[%c0_45, %c3_46] : memref<3x4xf32, #tpu.memory_space<smem>>
    %cst_47 = arith.constant dense<0.000000e+00> : vector<1x8xf32>
    %74 = tpu.matmul %69, %59, %cst_47 {dimension_numbers = #tpu.dot_dimension_numbers<[1], [0], [0], [1], [0, 0, 1, 1], [], []>} : vector<1x32xf32>, vector<32x8xf32>, vector<1x8xf32> -> vector<1x8xf32>
    %75 = vector.broadcast %72 : f32 to vector<1x8xf32>
    %76 = arith.addf %74, %75 : vector<1x8xf32>
    %77 = math.tanh %76 : vector<1x8xf32>
    %78 = vector.broadcast %71 : vector<32x1xf32> to vector<32x8xf32>
    %79 = vector.broadcast %77 : vector<1x8xf32> to vector<32x8xf32>
    %80 = arith.mulf %78, %79 : vector<32x8xf32>
    %81 = arith.addf %59, %80 : vector<32x8xf32>
    %82 = arith.mulf %77, %77 : vector<1x8xf32>
    %cst_48 = arith.constant 1.000000e+00 : f32
    %83 = vector.broadcast %cst_48 : f32 to vector<1x8xf32>
    %84 = arith.subf %83, %82 : vector<1x8xf32>
    %85 = vector.broadcast %73 : f32 to vector<1x8xf32>
    %86 = arith.mulf %84, %85 : vector<1x8xf32>
    %cst_49 = arith.constant 1.000000e+00 : f32
    %87 = vector.broadcast %cst_49 : f32 to vector<1x8xf32>
    %88 = arith.addf %87, %86 : vector<1x8xf32>
    %89 = arith.mulf %67, %88 : vector<1x8xf32>
    %90 = math.absf %89 : vector<1x8xf32>
    %cst_50 = arith.constant 9.99999993E-9 : f32
    %91 = vector.broadcast %cst_50 : f32 to vector<1x8xf32>
    %92 = arith.addf %90, %91 : vector<1x8xf32>
    %93 = math.log %92 : vector<1x8xf32>
    %94 = arith.mulf %81, %81 : vector<32x8xf32>
    %cst_51 = arith.constant dense<0.000000e+00> : vector<8xf32>
    %95 = vector.multi_reduction <add>, %94, %cst_51 [0] : vector<32x8xf32> to vector<8xf32>
    %96 = vector.shape_cast %95 : vector<8xf32> to vector<1x8xf32>
    %cst_52 = arith.constant -5.000000e-01 : f32
    %97 = vector.broadcast %cst_52 : f32 to vector<1x8xf32>
    %98 = arith.mulf %97, %96 : vector<1x8xf32>
    %cst_53 = arith.constant -29.4060326 : f32
    %99 = vector.broadcast %cst_53 : f32 to vector<1x8xf32>
    %100 = arith.addf %98, %99 : vector<1x8xf32>
    %101 = arith.addf %100, %93 : vector<1x8xf32>
    %c0_54 = arith.constant 0 : index
    %c0_55 = arith.constant 0 : index
    %102 = vector.load %arg5[%c0_54, %c0_55] : memref<3x8xf32, #tpu.memory_space<vmem>>, vector<1x8xf32>
    tpu.vector_store %arg5[%c0_54, %c0_55], %101 {strides = array<i32>} : memref<3x8xf32, #tpu.memory_space<vmem>>, vector<1x8xf32>,
    %cst_56 = arith.constant 1.000000e+00 : f32
    %103 = vector.broadcast %cst_56 : f32 to vector<1x8xf32>
    %c1_57 = arith.constant 1 : index
    %c0_58 = arith.constant 0 : index
    %c0_59 = arith.constant 0 : index
    %104 = vector.load %arg2[%c1_57, %c0_58, %c0_59] : memref<3x4x32xf32, #tpu.memory_space<vmem>>, vector<1x1x32xf32>
    %105 = vector.shape_cast %104 : vector<1x1x32xf32> to vector<1x32xf32>
    %c1_60 = arith.constant 1 : index
    %c0_61 = arith.constant 0 : index
    %c0_62 = arith.constant 0 : index
    %106 = vector.load %arg1[%c1_60, %c0_61, %c0_62] : memref<3x32x4xf32, #tpu.memory_space<vmem>>, vector<1x32x1xf32>
    %107 = vector.shape_cast %106 : vector<1x32x1xf32> to vector<32x1xf32>
    %c1_63 = arith.constant 1 : index
    %c0_64 = arith.constant 0 : index
    %108 = memref.load %arg3[%c1_63, %c0_64] : memref<3x4xf32, #tpu.memory_space<smem>>
    %c1_65 = arith.constant 1 : index
    %c0_66 = arith.constant 0 : index
    %109 = memref.load %arg4[%c1_65, %c0_66] : memref<3x4xf32, #tpu.memory_space<smem>>
    %cst_67 = arith.constant dense<0.000000e+00> : vector<1x8xf32>
    %110 = tpu.matmul %105, %0, %cst_67 {dimension_numbers = #tpu.dot_dimension_numbers<[1], [0], [0], [1], [0, 0, 1, 1], [], []>} : vector<1x32xf32>, vector<32x8xf32>, vector<1x8xf32> -> vector<1x8xf32>
    %111 = vector.broadcast %108 : f32 to vector<1x8xf32>
    %112 = arith.addf %110, %111 : vector<1x8xf32>
    %113 = math.tanh %112 : vector<1x8xf32>
    %114 = vector.broadcast %107 : vector<32x1xf32> to vector<32x8xf32>
    %115 = vector.broadcast %113 : vector<1x8xf32> to vector<32x8xf32>
    %116 = arith.mulf %114, %115 : vector<32x8xf32>
    %117 = arith.addf %0, %116 : vector<32x8xf32>
    %118 = arith.mulf %113, %113 : vector<1x8xf32>
    %cst_68 = arith.constant 1.000000e+00 : f32
    %119 = vector.broadcast %cst_68 : f32 to vector<1x8xf32>
    %120 = arith.subf %119, %118 : vector<1x8xf32>
    %121 = vector.broadcast %109 : f32 to vector<1x8xf32>
    %122 = arith.mulf %120, %121 : vector<1x8xf32>
    %cst_69 = arith.constant 1.000000e+00 : f32
    %123 = vector.broadcast %cst_69 : f32 to vector<1x8xf32>
    %124 = arith.addf %123, %122 : vector<1x8xf32>
    %125 = arith.mulf %103, %124 : vector<1x8xf32>
    %c1_70 = arith.constant 1 : index
    %c1_71 = arith.constant 1 : index
    %c0_72 = arith.constant 0 : index
    %126 = vector.load %arg2[%c1_70, %c1_71, %c0_72] : memref<3x4x32xf32, #tpu.memory_space<vmem>>, vector<1x1x32xf32>
    %127 = vector.shape_cast %126 : vector<1x1x32xf32> to vector<1x32xf32>
    %c1_73 = arith.constant 1 : index
    %c0_74 = arith.constant 0 : index
    %c1_75 = arith.constant 1 : index
    %128 = vector.load %arg1[%c1_73, %c0_74, %c1_75] : memref<3x32x4xf32, #tpu.memory_space<vmem>>, vector<1x32x1xf32>
    %129 = vector.shape_cast %128 : vector<1x32x1xf32> to vector<32x1xf32>
    %c1_76 = arith.constant 1 : index
    %c1_77 = arith.constant 1 : index
    %130 = memref.load %arg3[%c1_76, %c1_77] : memref<3x4xf32, #tpu.memory_space<smem>>
    %c1_78 = arith.constant 1 : index
    %c1_79 = arith.constant 1 : index
    %131 = memref.load %arg4[%c1_78, %c1_79] : memref<3x4xf32, #tpu.memory_space<smem>>
    %cst_80 = arith.constant dense<0.000000e+00> : vector<1x8xf32>
    %132 = tpu.matmul %127, %117, %cst_80 {dimension_numbers = #tpu.dot_dimension_numbers<[1], [0], [0], [1], [0, 0, 1, 1], [], []>} : vector<1x32xf32>, vector<32x8xf32>, vector<1x8xf32> -> vector<1x8xf32>
    %133 = vector.broadcast %130 : f32 to vector<1x8xf32>
    %134 = arith.addf %132, %133 : vector<1x8xf32>
    %135 = math.tanh %134 : vector<1x8xf32>
    %136 = vector.broadcast %129 : vector<32x1xf32> to vector<32x8xf32>
    %137 = vector.broadcast %135 : vector<1x8xf32> to vector<32x8xf32>
    %138 = arith.mulf %136, %137 : vector<32x8xf32>
    %139 = arith.addf %117, %138 : vector<32x8xf32>
    %140 = arith.mulf %135, %135 : vector<1x8xf32>
    %cst_81 = arith.constant 1.000000e+00 : f32
    %141 = vector.broadcast %cst_81 : f32 to vector<1x8xf32>
    %142 = arith.subf %141, %140 : vector<1x8xf32>
    %143 = vector.broadcast %131 : f32 to vector<1x8xf32>
    %144 = arith.mulf %142, %143 : vector<1x8xf32>
    %cst_82 = arith.constant 1.000000e+00 : f32
    %145 = vector.broadcast %cst_82 : f32 to vector<1x8xf32>
    %146 = arith.addf %145, %144 : vector<1x8xf32>
    %147 = arith.mulf %125, %146 : vector<1x8xf32>
    %c1_83 = arith.constant 1 : index
    %c2_84 = arith.constant 2 : index
    %c0_85 = arith.constant 0 : index
    %148 = vector.load %arg2[%c1_83, %c2_84, %c0_85] : memref<3x4x32xf32, #tpu.memory_space<vmem>>, vector<1x1x32xf32>
    %149 = vector.shape_cast %148 : vector<1x1x32xf32> to vector<1x32xf32>
    %c1_86 = arith.constant 1 : index
    %c0_87 = arith.constant 0 : index
    %c2_88 = arith.constant 2 : index
    %150 = vector.load %arg1[%c1_86, %c0_87, %c2_88] : memref<3x32x4xf32, #tpu.memory_space<vmem>>, vector<1x32x1xf32>
    %151 = vector.shape_cast %150 : vector<1x32x1xf32> to vector<32x1xf32>
    %c1_89 = arith.constant 1 : index
    %c2_90 = arith.constant 2 : index
    %152 = memref.load %arg3[%c1_89, %c2_90] : memref<3x4xf32, #tpu.memory_space<smem>>
    %c1_91 = arith.constant 1 : index
    %c2_92 = arith.constant 2 : index
    %153 = memref.load %arg4[%c1_91, %c2_92] : memref<3x4xf32, #tpu.memory_space<smem>>
    %cst_93 = arith.constant dense<0.000000e+00> : vector<1x8xf32>
    %154 = tpu.matmul %149, %139, %cst_93 {dimension_numbers = #tpu.dot_dimension_numbers<[1], [0], [0], [1], [0, 0, 1, 1], [], []>} : vector<1x32xf32>, vector<32x8xf32>, vector<1x8xf32> -> vector<1x8xf32>
    %155 = vector.broadcast %152 : f32 to vector<1x8xf32>
    %156 = arith.addf %154, %155 : vector<1x8xf32>
    %157 = math.tanh %156 : vector<1x8xf32>
    %158 = vector.broadcast %151 : vector<32x1xf32> to vector<32x8xf32>
    %159 = vector.broadcast %157 : vector<1x8xf32> to vector<32x8xf32>
    %160 = arith.mulf %158, %159 : vector<32x8xf32>
    %161 = arith.addf %139, %160 : vector<32x8xf32>
    %162 = arith.mulf %157, %157 : vector<1x8xf32>
    %cst_94 = arith.constant 1.000000e+00 : f32
    %163 = vector.broadcast %cst_94 : f32 to vector<1x8xf32>
    %164 = arith.subf %163, %162 : vector<1x8xf32>
    %165 = vector.broadcast %153 : f32 to vector<1x8xf32>
    %166 = arith.mulf %164, %165 : vector<1x8xf32>
    %cst_95 = arith.constant 1.000000e+00 : f32
    %167 = vector.broadcast %cst_95 : f32 to vector<1x8xf32>
    %168 = arith.addf %167, %166 : vector<1x8xf32>
    %169 = arith.mulf %147, %168 : vector<1x8xf32>
    %c1_96 = arith.constant 1 : index
    %c3_97 = arith.constant 3 : index
    %c0_98 = arith.constant 0 : index
    %170 = vector.load %arg2[%c1_96, %c3_97, %c0_98] : memref<3x4x32xf32, #tpu.memory_space<vmem>>, vector<1x1x32xf32>
    %171 = vector.shape_cast %170 : vector<1x1x32xf32> to vector<1x32xf32>
    %c1_99 = arith.constant 1 : index
    %c0_100 = arith.constant 0 : index
    %c3_101 = arith.constant 3 : index
    %172 = vector.load %arg1[%c1_99, %c0_100, %c3_101] : memref<3x32x4xf32, #tpu.memory_space<vmem>>, vector<1x32x1xf32>
    %173 = vector.shape_cast %172 : vector<1x32x1xf32> to vector<32x1xf32>
    %c1_102 = arith.constant 1 : index
    %c3_103 = arith.constant 3 : index
    %174 = memref.load %arg3[%c1_102, %c3_103] : memref<3x4xf32, #tpu.memory_space<smem>>
    %c1_104 = arith.constant 1 : index
    %c3_105 = arith.constant 3 : index
    %175 = memref.load %arg4[%c1_104, %c3_105] : memref<3x4xf32, #tpu.memory_space<smem>>
    %cst_106 = arith.constant dense<0.000000e+00> : vector<1x8xf32>
    %176 = tpu.matmul %171, %161, %cst_106 {dimension_numbers = #tpu.dot_dimension_numbers<[1], [0], [0], [1], [0, 0, 1, 1], [], []>} : vector<1x32xf32>, vector<32x8xf32>, vector<1x8xf32> -> vector<1x8xf32>
    %177 = vector.broadcast %174 : f32 to vector<1x8xf32>
    %178 = arith.addf %176, %177 : vector<1x8xf32>
    %179 = math.tanh %178 : vector<1x8xf32>
    %180 = vector.broadcast %173 : vector<32x1xf32> to vector<32x8xf32>
    %181 = vector.broadcast %179 : vector<1x8xf32> to vector<32x8xf32>
    %182 = arith.mulf %180, %181 : vector<32x8xf32>
    %183 = arith.addf %161, %182 : vector<32x8xf32>
    %184 = arith.mulf %179, %179 : vector<1x8xf32>
    %cst_107 = arith.constant 1.000000e+00 : f32
    %185 = vector.broadcast %cst_107 : f32 to vector<1x8xf32>
    %186 = arith.subf %185, %184 : vector<1x8xf32>
    %187 = vector.broadcast %175 : f32 to vector<1x8xf32>
    %188 = arith.mulf %186, %187 : vector<1x8xf32>
    %cst_108 = arith.constant 1.000000e+00 : f32
    %189 = vector.broadcast %cst_108 : f32 to vector<1x8xf32>
    %190 = arith.addf %189, %188 : vector<1x8xf32>
    %191 = arith.mulf %169, %190 : vector<1x8xf32>
    %192 = math.absf %191 : vector<1x8xf32>
    %cst_109 = arith.constant 9.99999993E-9 : f32
    %193 = vector.broadcast %cst_109 : f32 to vector<1x8xf32>
    %194 = arith.addf %192, %193 : vector<1x8xf32>
    %195 = math.log %194 : vector<1x8xf32>
    %196 = arith.mulf %183, %183 : vector<32x8xf32>
    %cst_110 = arith.constant dense<0.000000e+00> : vector<8xf32>
    %197 = vector.multi_reduction <add>, %196, %cst_110 [0] : vector<32x8xf32> to vector<8xf32>
    %198 = vector.shape_cast %197 : vector<8xf32> to vector<1x8xf32>
    %cst_111 = arith.constant -5.000000e-01 : f32
    %199 = vector.broadcast %cst_111 : f32 to vector<1x8xf32>
    %200 = arith.mulf %199, %198 : vector<1x8xf32>
    %cst_112 = arith.constant -29.4060326 : f32
    %201 = vector.broadcast %cst_112 : f32 to vector<1x8xf32>
    %202 = arith.addf %200, %201 : vector<1x8xf32>
    %203 = arith.addf %202, %195 : vector<1x8xf32>
    %c1_113 = arith.constant 1 : index
    %c0_114 = arith.constant 0 : index
    %204 = vector.load %arg5[%c1_113, %c0_114] : memref<3x8xf32, #tpu.memory_space<vmem>>, vector<1x8xf32>
    tpu.vector_store %arg5[%c1_113, %c0_114], %203 {strides = array<i32>} : memref<3x8xf32, #tpu.memory_space<vmem>>, vector<1x8xf32>,
    %cst_115 = arith.constant 1.000000e+00 : f32
    %205 = vector.broadcast %cst_115 : f32 to vector<1x8xf32>
    %c2_116 = arith.constant 2 : index
    %c0_117 = arith.constant 0 : index
    %c0_118 = arith.constant 0 : index
    %206 = vector.load %arg2[%c2_116, %c0_117, %c0_118] : memref<3x4x32xf32, #tpu.memory_space<vmem>>, vector<1x1x32xf32>
    %207 = vector.shape_cast %206 : vector<1x1x32xf32> to vector<1x32xf32>
    %c2_119 = arith.constant 2 : index
    %c0_120 = arith.constant 0 : index
    %c0_121 = arith.constant 0 : index
    %208 = vector.load %arg1[%c2_119, %c0_120, %c0_121] : memref<3x32x4xf32, #tpu.memory_space<vmem>>, vector<1x32x1xf32>
    %209 = vector.shape_cast %208 : vector<1x32x1xf32> to vector<32x1xf32>
    %c2_122 = arith.constant 2 : index
    %c0_123 = arith.constant 0 : index
    %210 = memref.load %arg3[%c2_122, %c0_123] : memref<3x4xf32, #tpu.memory_space<smem>>
    %c2_124 = arith.constant 2 : index
    %c0_125 = arith.constant 0 : index
    %211 = memref.load %arg4[%c2_124, %c0_125] : memref<3x4xf32, #tpu.memory_space<smem>>
    %cst_126 = arith.constant dense<0.000000e+00> : vector<1x8xf32>
    %212 = tpu.matmul %207, %0, %cst_126 {dimension_numbers = #tpu.dot_dimension_numbers<[1], [0], [0], [1], [0, 0, 1, 1], [], []>} : vector<1x32xf32>, vector<32x8xf32>, vector<1x8xf32> -> vector<1x8xf32>
    %213 = vector.broadcast %210 : f32 to vector<1x8xf32>
    %214 = arith.addf %212, %213 : vector<1x8xf32>
    %215 = math.tanh %214 : vector<1x8xf32>
    %216 = vector.broadcast %209 : vector<32x1xf32> to vector<32x8xf32>
    %217 = vector.broadcast %215 : vector<1x8xf32> to vector<32x8xf32>
    %218 = arith.mulf %216, %217 : vector<32x8xf32>
    %219 = arith.addf %0, %218 : vector<32x8xf32>
    %220 = arith.mulf %215, %215 : vector<1x8xf32>
    %cst_127 = arith.constant 1.000000e+00 : f32
    %221 = vector.broadcast %cst_127 : f32 to vector<1x8xf32>
    %222 = arith.subf %221, %220 : vector<1x8xf32>
    %223 = vector.broadcast %211 : f32 to vector<1x8xf32>
    %224 = arith.mulf %222, %223 : vector<1x8xf32>
    %cst_128 = arith.constant 1.000000e+00 : f32
    %225 = vector.broadcast %cst_128 : f32 to vector<1x8xf32>
    %226 = arith.addf %225, %224 : vector<1x8xf32>
    %227 = arith.mulf %205, %226 : vector<1x8xf32>
    %c2_129 = arith.constant 2 : index
    %c1_130 = arith.constant 1 : index
    %c0_131 = arith.constant 0 : index
    %228 = vector.load %arg2[%c2_129, %c1_130, %c0_131] : memref<3x4x32xf32, #tpu.memory_space<vmem>>, vector<1x1x32xf32>
    %229 = vector.shape_cast %228 : vector<1x1x32xf32> to vector<1x32xf32>
    %c2_132 = arith.constant 2 : index
    %c0_133 = arith.constant 0 : index
    %c1_134 = arith.constant 1 : index
    %230 = vector.load %arg1[%c2_132, %c0_133, %c1_134] : memref<3x32x4xf32, #tpu.memory_space<vmem>>, vector<1x32x1xf32>
    %231 = vector.shape_cast %230 : vector<1x32x1xf32> to vector<32x1xf32>
    %c2_135 = arith.constant 2 : index
    %c1_136 = arith.constant 1 : index
    %232 = memref.load %arg3[%c2_135, %c1_136] : memref<3x4xf32, #tpu.memory_space<smem>>
    %c2_137 = arith.constant 2 : index
    %c1_138 = arith.constant 1 : index
    %233 = memref.load %arg4[%c2_137, %c1_138] : memref<3x4xf32, #tpu.memory_space<smem>>
    %cst_139 = arith.constant dense<0.000000e+00> : vector<1x8xf32>
    %234 = tpu.matmul %229, %219, %cst_139 {dimension_numbers = #tpu.dot_dimension_numbers<[1], [0], [0], [1], [0, 0, 1, 1], [], []>} : vector<1x32xf32>, vector<32x8xf32>, vector<1x8xf32> -> vector<1x8xf32>
    %235 = vector.broadcast %232 : f32 to vector<1x8xf32>
    %236 = arith.addf %234, %235 : vector<1x8xf32>
    %237 = math.tanh %236 : vector<1x8xf32>
    %238 = vector.broadcast %231 : vector<32x1xf32> to vector<32x8xf32>
    %239 = vector.broadcast %237 : vector<1x8xf32> to vector<32x8xf32>
    %240 = arith.mulf %238, %239 : vector<32x8xf32>
    %241 = arith.addf %219, %240 : vector<32x8xf32>
    %242 = arith.mulf %237, %237 : vector<1x8xf32>
    %cst_140 = arith.constant 1.000000e+00 : f32
    %243 = vector.broadcast %cst_140 : f32 to vector<1x8xf32>
    %244 = arith.subf %243, %242 : vector<1x8xf32>
    %245 = vector.broadcast %233 : f32 to vector<1x8xf32>
    %246 = arith.mulf %244, %245 : vector<1x8xf32>
    %cst_141 = arith.constant 1.000000e+00 : f32
    %247 = vector.broadcast %cst_141 : f32 to vector<1x8xf32>
    %248 = arith.addf %247, %246 : vector<1x8xf32>
    %249 = arith.mulf %227, %248 : vector<1x8xf32>
    %c2_142 = arith.constant 2 : index
    %c2_143 = arith.constant 2 : index
    %c0_144 = arith.constant 0 : index
    %250 = vector.load %arg2[%c2_142, %c2_143, %c0_144] : memref<3x4x32xf32, #tpu.memory_space<vmem>>, vector<1x1x32xf32>
    %251 = vector.shape_cast %250 : vector<1x1x32xf32> to vector<1x32xf32>
    %c2_145 = arith.constant 2 : index
    %c0_146 = arith.constant 0 : index
    %c2_147 = arith.constant 2 : index
    %252 = vector.load %arg1[%c2_145, %c0_146, %c2_147] : memref<3x32x4xf32, #tpu.memory_space<vmem>>, vector<1x32x1xf32>
    %253 = vector.shape_cast %252 : vector<1x32x1xf32> to vector<32x1xf32>
    %c2_148 = arith.constant 2 : index
    %c2_149 = arith.constant 2 : index
    %254 = memref.load %arg3[%c2_148, %c2_149] : memref<3x4xf32, #tpu.memory_space<smem>>
    %c2_150 = arith.constant 2 : index
    %c2_151 = arith.constant 2 : index
    %255 = memref.load %arg4[%c2_150, %c2_151] : memref<3x4xf32, #tpu.memory_space<smem>>
    %cst_152 = arith.constant dense<0.000000e+00> : vector<1x8xf32>
    %256 = tpu.matmul %251, %241, %cst_152 {dimension_numbers = #tpu.dot_dimension_numbers<[1], [0], [0], [1], [0, 0, 1, 1], [], []>} : vector<1x32xf32>, vector<32x8xf32>, vector<1x8xf32> -> vector<1x8xf32>
    %257 = vector.broadcast %254 : f32 to vector<1x8xf32>
    %258 = arith.addf %256, %257 : vector<1x8xf32>
    %259 = math.tanh %258 : vector<1x8xf32>
    %260 = vector.broadcast %253 : vector<32x1xf32> to vector<32x8xf32>
    %261 = vector.broadcast %259 : vector<1x8xf32> to vector<32x8xf32>
    %262 = arith.mulf %260, %261 : vector<32x8xf32>
    %263 = arith.addf %241, %262 : vector<32x8xf32>
    %264 = arith.mulf %259, %259 : vector<1x8xf32>
    %cst_153 = arith.constant 1.000000e+00 : f32
    %265 = vector.broadcast %cst_153 : f32 to vector<1x8xf32>
    %266 = arith.subf %265, %264 : vector<1x8xf32>
    %267 = vector.broadcast %255 : f32 to vector<1x8xf32>
    %268 = arith.mulf %266, %267 : vector<1x8xf32>
    %cst_154 = arith.constant 1.000000e+00 : f32
    %269 = vector.broadcast %cst_154 : f32 to vector<1x8xf32>
    %270 = arith.addf %269, %268 : vector<1x8xf32>
    %271 = arith.mulf %249, %270 : vector<1x8xf32>
    %c2_155 = arith.constant 2 : index
    %c3_156 = arith.constant 3 : index
    %c0_157 = arith.constant 0 : index
    %272 = vector.load %arg2[%c2_155, %c3_156, %c0_157] : memref<3x4x32xf32, #tpu.memory_space<vmem>>, vector<1x1x32xf32>
    %273 = vector.shape_cast %272 : vector<1x1x32xf32> to vector<1x32xf32>
    %c2_158 = arith.constant 2 : index
    %c0_159 = arith.constant 0 : index
    %c3_160 = arith.constant 3 : index
    %274 = vector.load %arg1[%c2_158, %c0_159, %c3_160] : memref<3x32x4xf32, #tpu.memory_space<vmem>>, vector<1x32x1xf32>
    %275 = vector.shape_cast %274 : vector<1x32x1xf32> to vector<32x1xf32>
    %c2_161 = arith.constant 2 : index
    %c3_162 = arith.constant 3 : index
    %276 = memref.load %arg3[%c2_161, %c3_162] : memref<3x4xf32, #tpu.memory_space<smem>>
    %c2_163 = arith.constant 2 : index
    %c3_164 = arith.constant 3 : index
    %277 = memref.load %arg4[%c2_163, %c3_164] : memref<3x4xf32, #tpu.memory_space<smem>>
    %cst_165 = arith.constant dense<0.000000e+00> : vector<1x8xf32>
    %278 = tpu.matmul %273, %263, %cst_165 {dimension_numbers = #tpu.dot_dimension_numbers<[1], [0], [0], [1], [0, 0, 1, 1], [], []>} : vector<1x32xf32>, vector<32x8xf32>, vector<1x8xf32> -> vector<1x8xf32>
    %279 = vector.broadcast %276 : f32 to vector<1x8xf32>
    %280 = arith.addf %278, %279 : vector<1x8xf32>
    %281 = math.tanh %280 : vector<1x8xf32>
    %282 = vector.broadcast %275 : vector<32x1xf32> to vector<32x8xf32>
    %283 = vector.broadcast %281 : vector<1x8xf32> to vector<32x8xf32>
    %284 = arith.mulf %282, %283 : vector<32x8xf32>
    %285 = arith.addf %263, %284 : vector<32x8xf32>
    %286 = arith.mulf %281, %281 : vector<1x8xf32>
    %cst_166 = arith.constant 1.000000e+00 : f32
    %287 = vector.broadcast %cst_166 : f32 to vector<1x8xf32>
    %288 = arith.subf %287, %286 : vector<1x8xf32>
    %289 = vector.broadcast %277 : f32 to vector<1x8xf32>
    %290 = arith.mulf %288, %289 : vector<1x8xf32>
    %cst_167 = arith.constant 1.000000e+00 : f32
    %291 = vector.broadcast %cst_167 : f32 to vector<1x8xf32>
    %292 = arith.addf %291, %290 : vector<1x8xf32>
    %293 = arith.mulf %271, %292 : vector<1x8xf32>
    %294 = math.absf %293 : vector<1x8xf32>
    %cst_168 = arith.constant 9.99999993E-9 : f32
    %295 = vector.broadcast %cst_168 : f32 to vector<1x8xf32>
    %296 = arith.addf %294, %295 : vector<1x8xf32>
    %297 = math.log %296 : vector<1x8xf32>
    %298 = arith.mulf %285, %285 : vector<32x8xf32>
    %cst_169 = arith.constant dense<0.000000e+00> : vector<8xf32>
    %299 = vector.multi_reduction <add>, %298, %cst_169 [0] : vector<32x8xf32> to vector<8xf32>
    %300 = vector.shape_cast %299 : vector<8xf32> to vector<1x8xf32>
    %cst_170 = arith.constant -5.000000e-01 : f32
    %301 = vector.broadcast %cst_170 : f32 to vector<1x8xf32>
    %302 = arith.mulf %301, %300 : vector<1x8xf32>
    %cst_171 = arith.constant -29.4060326 : f32
    %303 = vector.broadcast %cst_171 : f32 to vector<1x8xf32>
    %304 = arith.addf %302, %303 : vector<1x8xf32>
    %305 = arith.addf %304, %297 : vector<1x8xf32>
    %c2_172 = arith.constant 2 : index
    %c0_173 = arith.constant 0 : index
    %306 = vector.load %arg5[%c2_172, %c0_173] : memref<3x8xf32, #tpu.memory_space<vmem>>, vector<1x8xf32>
    tpu.vector_store %arg5[%c2_172, %c0_173], %305 {strides = array<i32>} : memref<3x8xf32, #tpu.memory_space<vmem>>, vector<1x8xf32>,
    return
  }
}

</mosaic_0001>

<bundles_post_ra>
// kernel: tpu_custom_call.1
= control target key start
LH: loop header
LB: loop body
LE: loop exit
PB: predicated region body
PF: predicated region fallthrough
CT: control target
= control target key end

     0   :  { %10 = vsyncpa [#allocation4], 0  ;;  %s2456_s0 = inlined_call_operand.vmem [shape: f32[32,8], index: 0, kind: input, shape index: {}]   ;;  %s2457_s1 = inlined_call_operand.vmem [shape: f32[3,32,4], index: 1, kind: input, shape index: {}]   ;;  %s2458_s2 = inlined_call_operand.vmem [shape: f32[3,4,32], index: 2, kind: input, shape index: {}]   ;;  %s2459_s3 = inlined_call_operand.vmem [shape: f32[3,4], index: 3, kind: input, shape index: {}]   ;;  %s2460_s4 = inlined_call_operand.vmem [shape: f32[3,4], index: 4, kind: input, shape index: {}]   ;;  %s2461_s5 = inlined_call_operand.hbm [shape: f32[3,8], index: 5, kind: output, shape index: {}]  }
   0x1   :  { %11 = vsyncpa [#allocation6], 0 }
   0x2   :  { %12 = vsyncpa [#allocation3], 0  ;;  %s25_s20 = sshll.u32 %s2459_s3, 4  ;;  %s35_s23 = sshll.u32 %s2460_s4, 4  ;;  %s26_s20 = int_to_ptr.vmem [resolvable:$true] %s25_s20  ;;  %s36_s23 = int_to_ptr.vmem [resolvable:$true] %s35_s23 }
   0x3   :  { %s1887_s24 = scalar_lea.vmem %s26_s20, 64  ;;  %p1892_p1 = scmp.lt.s32.totalorder %s26_s20, %s26_s20 }
   0x4   :  { %p1888_p0 = scmp.ne.s32.totalorder %s26_s20, %s1887_s24  ;;  %p1893_p2 = scmp.lt.s32.totalorder %s1887_s24, %s1887_s24 }
   0x6   :  { %p1894_p3 = por %p1893_p2, %p1892_p1 }
   0x8   :  { %p1895_p4 = pnand %p1894_p3, %p1888_p0 }
   0xa   :  { %1898 = shalt.err (!%p1895_p4)
}
   0xb   :  { %s1939_s25 = smov [#allocation2]   ;;  %s1899_s26 = scalar_lea.vmem %s36_s23, 64 }
   0xc   :  { %28 = dma.vmem_to_smem %s26_s20, 64, %s1939_s25, [#allocation4]  }
   0xd   :  { %p1900_p5 = scmp.ne.s32.totalorder %s36_s23, %s1899_s26  ;;  %p1904_p6 = scmp.lt.s32.totalorder %s36_s23, %s36_s23 }
   0xe   :  { %p1905_p7 = scmp.lt.s32.totalorder %s1899_s26, %s1899_s26 }
  0x10   :  { %p1906_p8 = por %p1905_p7, %p1904_p6 }
  0x12   :  { %p1907_p9 = pnand %p1906_p8, %p1900_p5 }
  0x14   :  { %1910 = shalt.err (!%p1907_p9)
}
  0x15   :  { %s1940_s3 = smov [#allocation5]  }
  0x16   :  { %38 = dma.vmem_to_smem %s36_s23, 64, %s1940_s3, [#allocation6]  }
  0x17   :  { %1933 = dma.done.wait [#allocation4], 64  }
  0x18   :  { %1934 = vsyncadd [#allocation4], 4294967232 }
  0x19   :  { %1935 = dma.done.wait [#allocation6], 64  }
  0x1a   :  { %1936 = vsyncadd [#allocation6], 4294967232 }
  0x1b   :  { %45 = sfence }
  0x1c   :  { %v1988_v0 = vld [vmem:[%s2456_s0] sm:$0xff]  ;;  %v1993_v1 = vld [vmem:[%s2456_s0 + $0x8] sm:$0xff]  ;;  %v1998_v2 = vld [vmem:[%s2456_s0 + $0x10] sm:$0xff]  ;;  %v1941_v3 = vmov 0.0|0.0   ;;  %vm1942_vm0 = vmmov 0   ;;  %v2462_v6 = vmov 0.0   ;;  %v153_v19 = vlaneseq }
  0x1d   :  { %1755 = vmatprep.subr.bf16.mxu0 %v1941_v3  ;;  %v2003_v4 = vpack.c.bf16 %v1993_v1, %v1988_v0  ;;  %v2008_v5 = vld [vmem:[%s2456_s0 + $0x18] sm:$0xff]  ;;  %1631 = vmatprep.mubr.msk.f32.mxu0 %vm1942_vm0, %v2462_v6  ;;  %v2015_v7 = vld [vmem:[%s2457_s1] sm:$0xff]  ;;  %v1944_v8 = vmov 0   ;;  %v2022_v9 = vld [vmem:[%s2457_s1 + $0x10] sm:$0xff]  ;;  %vm58_vm1 = vcmask 261120   ;;  %v1945_v14 = vmov 1  }
  0x1e   :  { %1837 = vset.pattern.permute.xlu0 %v1944_v8  ;;  %1838 = vset.pattern.permute.xlu1 %v1944_v8  ;;  %v2027_v10 = vpack.c.bf16 %v2008_v5, %v1998_v2  ;;  %v2035_v11 = vld [vmem:[%s2457_s1 + $0x8] sm:$0xff]  ;;  %v2040_v12 = vld [vmem:[%s2457_s1 + $0x18] sm:$0xff]  ;;  %v50_v13 = vld [vmem:[%s2458_s2] sm:$0x1]  ;;  %s55_s18 = sld [smem:[#allocation2]]  ;;  %v154_v20 = vshrl.u32 %v153_v19, 7 }
  0x1f   :  { %1757 = vmatpush3.bf16.msra.mxu0 %v2003_v4  ;;  %135 = vperm.xlu0 %1837, %v2015_v7   ;;  %v170_v38 = vld [vmem:[%s2458_s2 + $0x1] sm:$0x1]  ;;  %v1946_v39 = vmov 2   ;;  %v2103_v41 = vld [vmem:[%s2457_s1 + $0x38] sm:$0xff]  ;;  %v2110_v42 = vld [vmem:[%s2457_s1 + $0x28] sm:$0xff]  ;;  %s1514_s27 = sld [smem:[#allocation2 + $0x1]] }
  0x20   :  { %1758 = vmatprep.subr.bf16.mxu0 %v1941_v3  ;;  %145 = vperm.xlu1 %1838, %v2022_v9   ;;  %v2061_v23 = vsub.s32 0, %v154_v20  ;;  %v2095_v40 = vld [vmem:[%s2457_s1 + $0x20] sm:$0xff]  ;;  %v2118_v43 = vld [vmem:[%s2457_s1 + $0x30] sm:$0xff]  ;;  %s56_s28 = sld [smem:[#allocation5]]  ;;  %s1515_s29 = sld [smem:[#allocation5 + $0x1]]  ;;  %vm514_vm2 = vcmask 64512  }
  0x21   :  { %1761 = vmatprep.subr.bf16.mxu1 %v1941_v3  ;;  %1642 = vmatprep.mubr.msk.f32.mxu1 %vm1942_vm0, %v2462_v6  ;;  %s1528_s16 = sld [smem:[#allocation2 + $0x80]]  ;;  %s1518_s17 = sld [smem:[#allocation5 + $0x2]]  ;;  %vm531_vm3 = vcmask 57344  }
  0x22   :  { %s1520_s22 = sld [smem:[#allocation2 + $0x3]]  ;;  %s1532_s23 = sld [smem:[#allocation2 + $0x81]] }
  0x23   :  { %1760 = vmatpush3.bf16.msra.mxu0 %v2027_v10  ;;  %140 = vperm.xlu0 %1837, %v2035_v11   ;;  %s1521_s24 = sld [smem:[#allocation5 + $0x3]]  ;;  %s1529_s25 = sld [smem:[#allocation5 + $0x80]] }
  0x24   :  { %150 = vperm.xlu1 %1838, %v2040_v12   ;;  %1767 = vmatprep.subr.bf16.mxu0 %v1941_v3  ;;  %v57_v15 = vstv %s55_s18  ;;  %s2304_s26 = sld [smem:[#allocation5 + $0x81]]  ;;  %s1548_s30 = sld [smem:[#allocation2 + $0x100]] }
  0x25   :  { %v173_v44 = vstv %s1514_s27  ;;  %s1537_s6 = sld [smem:[#allocation5 + $0x82]]  ;;  %s1540_s11 = sld [smem:[#allocation2 + $0x83]] }
  0x26   :  { %1632 = vmatmul.mubr.msk.f32.vlgmr.msra.gmra.mrb[0].mxu0 %vm58_vm1, %v50_v13  ;;  %v167_v52 = vstv %s56_s28  ;;  %v278_v59 = vstv %s1515_s29  ;;  %s1536_s29 = sld [smem:[#allocation2 + $0x82]]  ;;  %s1552_s12 = sld [smem:[#allocation2 + $0x101]] }
  0x27   :  { %1653 = vmatprep.mubr.msk.f32.mxu0 %vm1942_vm0, %v2462_v6  ;;  %1839 = vset.pattern.permute.xlu0 %v1945_v14  ;;  %s1541_s0 = sld [smem:[#allocation5 + $0x83]]  ;;  %s1549_s13 = sld [smem:[#allocation5 + $0x100]] }
  0x28   :  { %1840 = vset.pattern.permute.xlu1 %v1945_v14  ;;  %249 = vperm.xlu0 %1839, %v2015_v7   ;;  %s2397_s14 = sld [smem:[#allocation5 + $0x101]]  ;;  %s1560_s20 = sld [smem:[#allocation2 + $0x103]] }
  0x29   :  { %253 = vperm.xlu1 %1840, %v2035_v11   ;;  %s1561_s21 = sld [smem:[#allocation5 + $0x103]] }
  0x2c   :  { %261 = vperm.xlu0 %1839, %v2040_v12  }
  0x2d   :  { %257 = vperm.xlu1 %1840, %v2022_v9  }
  0x30   :  { %1842 = vset.pattern.permute.xlu0 %v1946_v39 }
  0x31   :  { %1841 = vset.pattern.permute.xlu1 %v1946_v39  ;;  %365 = vperm.xlu0 %1842, %v2035_v11  }
  0x32   :  { %361 = vperm.xlu1 %1841, %v2015_v7  }
  0x35   :  { %1843 = vset.pattern.permute.xlu0 %v1944_v8 }
  0x36   :  { %369 = vperm.xlu1 %1841, %v2022_v9   ;;  %619 = vperm.xlu0 %1843, %v2095_v40  }
  0x3a   :  { %373 = vperm.xlu1 %1841, %v2040_v12   ;;  %634 = vperm.xlu0 %1843, %v2103_v41  }
  0x3e   :  { %1844 = vset.pattern.permute.xlu1 %v1944_v8  ;;  %1846 = vset.pattern.permute.xlu0 %v1945_v14 }
  0x3f   :  { %624 = vperm.xlu1 %1844, %v2110_v42   ;;  %737 = vperm.xlu0 %1846, %v2110_v42  }
  0x43   :  { %629 = vperm.xlu1 %1844, %v2118_v43   ;;  %1847 = vset.pattern.permute.xlu0 %v1946_v39 }
  0x44   :  { %845 = vperm.xlu0 %1847, %v2095_v40  }
  0x47   :  { %1845 = vset.pattern.permute.xlu1 %v1945_v14 }
  0x48   :  { %733 = vperm.xlu1 %1845, %v2095_v40   ;;  %857 = vperm.xlu0 %1847, %v2103_v41  }
  0x4c   :  { %741 = vperm.xlu1 %1845, %v2118_v43   ;;  %1850 = vset.pattern.permute.xlu0 %v1944_v8 }
  0x50   :  { %745 = vperm.xlu1 %1845, %v2103_v41  }
  0x54   :  { %1848 = vset.pattern.permute.xlu1 %v1946_v39 }
  0x55   :  { %849 = vperm.xlu1 %1848, %v2110_v42  }
  0x59   :  { %853 = vperm.xlu1 %1848, %v2118_v43  }
  0x5d   :  { %1849 = vset.pattern.permute.xlu1 %v1944_v8 }
  0x9e   :  { %v136_v22 = vpop.permute.xlu0 %135 }
  0x9f   :  { %v146_v21 = vpop.permute.xlu1 %145 }
  0xa2   :  { %v141_v27 = vpop.permute.xlu0 %140 }
  0xa3   :  { %v151_v26 = vpop.permute.xlu1 %150 }
  0xa7   :  { %v250_v50 = vpop.permute.xlu0 %249 }
  0xa8   :  { %v254_v49 = vpop.permute.xlu1 %253 }
  0xab   :  { %v262_v57 = vpop.permute.xlu0 %261 }
  0xac   :  { %v258_v54 = vpop.permute.xlu1 %257 }
  0xf9   :  { %v128_v16 = vpop.f32.mrb[0].mxu0 }
  0xfa   :  { %v129_v17 = vadd.f32 %v128_v16, %v57_v15  ;;  %v1633_v18 = vpop.f32.mrb[1].mxu0 }
  0xfc   :  { %1857 = vtanh.f32 %v129_v17 }
 0x106   :  { %v1858_v24 = vpop.eup %1857 }
 0x107   :  { %v156_v25 = vrot.slane %v1858_v24, %v2061_v23  ;;  %v165_v48 = vmul.f32 %v1858_v24, %v1858_v24 }
 0x109   :  { %v157_v28 = vmul.f32 %v156_v25, %v136_v22  ;;  %v159_v29 = vmul.f32 %v156_v25, %v146_v21  ;;  %v158_v30 = vmul.f32 %v156_v25, %v141_v27  ;;  %v160_v31 = vmul.f32 %v156_v25, %v151_v26  ;;  %v282_v25 = vld [vmem:[%s2458_s2 + $0x2] sm:$0x1]  ;;  %v1523_v26 = vld [vmem:[%s2458_s2 + $0x4] sm:$0x1] }
 0x10a   :  { %v166_v51 = vsub.f32 1.0, %v165_v48  ;;  %v1544_v27 = vld [vmem:[%s2457_s1 + $0x40] sm:$0xff] }
 0x10b   :  { %v2065_v32 = vadd.f32 %v157_v28, %v1988_v0  ;;  %v2068_v33 = vadd.f32 %v158_v30, %v1993_v1  ;;  %v2071_v34 = vadd.f32 %v159_v29, %v1998_v2  ;;  %v2074_v35 = vadd.f32 %v160_v31, %v2008_v5  ;;  %1101 = vperm.xlu1 %1849, %v1544_v27   ;;  %v1545_v28 = vld [vmem:[%s2457_s1 + $0x48] sm:$0xff]  ;;  %v1546_v29 = vld [vmem:[%s2457_s1 + $0x50] sm:$0xff]  ;;  %v1547_v30 = vld [vmem:[%s2457_s1 + $0x58] sm:$0xff]  ;;  %s1517_s1 = sld [smem:[#allocation2 + $0x2]] }
 0x10c   :  { %v168_v58 = vmul.f32 %v167_v52, %v166_v51  ;;  %1106 = vperm.xlu0 %1850, %v1545_v28   ;;  %v1947_v31 = vmov 3  }
 0x10d   :  { %v1762_v36 = vpack.c.bf16 %v2068_v33, %v2065_v32  ;;  %v1765_v37 = vpack.c.bf16 %v2074_v35, %v2071_v34 }
 0x10e   :  { %v169_v17 = vadd.f32 1.0, %v168_v58 }
 0x10f   :  { %1763 = vmatpush3.bf16.msra.mxu1 %v1762_v36  ;;  %1111 = vperm.xlu1 %1849, %v1546_v29  }
 0x110   :  { %1764 = vmatprep.subr.bf16.mxu1 %v1941_v3  ;;  %1851 = vset.pattern.permute.xlu0 %v1945_v14 }
 0x111   :  { %1215 = vperm.xlu0 %1851, %v1544_v27  }
 0x113   :  { %1766 = vmatpush3.bf16.msra.mxu1 %v1765_v37  ;;  %1116 = vperm.xlu1 %1849, %v1547_v30  }
 0x114   :  { %1773 = vmatprep.subr.bf16.mxu1 %v1941_v3 }
 0x115   :  { %1227 = vperm.xlu0 %1851, %v1547_v30  }
 0x116   :  { %1643 = vmatmul.mubr.msk.f32.vlgmr.msra.gmra.mrb[0].mxu1 %vm58_vm1, %v170_v38  ;;  %v366_v38 = vpop.permute.xlu0 %365 }
 0x117   :  { %1664 = vmatprep.mubr.msk.f32.mxu1 %vm1942_vm0, %v2462_v6  ;;  %1852 = vset.pattern.permute.xlu1 %v1945_v14 }
 0x118   :  { %1219 = vperm.xlu1 %1852, %v1545_v28  }
 0x119   :  { %1854 = vset.pattern.permute.xlu0 %v1946_v39 }
 0x11a   :  { %1331 = vperm.xlu0 %1854, %v1545_v28  }
 0x11c   :  { %1223 = vperm.xlu1 %1852, %v1546_v29  }
 0x11e   :  { %1855 = vset.pattern.permute.xlu0 %v1947_v31 }
 0x11f   :  { %473 = vperm.xlu0 %1855, %v2015_v7   ;;  %v285_v7 = vstv %s1517_s1 }
 0x120   :  { %1853 = vset.pattern.permute.xlu1 %v1946_v39 }
 0x121   :  { %1327 = vperm.xlu1 %1853, %v1544_v27  }
 0x123   :  { %961 = vperm.xlu0 %1855, %v2110_v42   ;;  %v390_v42 = vstv %s1518_s17  ;;  %s1557_s17 = sld [smem:[#allocation5 + $0x102]] }
 0x125   :  { %1335 = vperm.xlu1 %1853, %v1546_v29  }
 0x127   :  { %1443 = vperm.xlu0 %1855, %v1545_v28  }
 0x129   :  { %1339 = vperm.xlu1 %1853, %v1547_v30  }
 0x12b   :  { %965 = vperm.xlu0 %1855, %v2118_v43  }
 0x12d   :  { %1856 = vset.pattern.permute.xlu1 %v1947_v31 }
 0x12e   :  { %477 = vperm.xlu1 %1856, %v2035_v11  }
 0x12f   :  { %485 = vperm.xlu0 %1855, %v2040_v12  }
 0x132   :  { %957 = vperm.xlu1 %1856, %v2095_v40  }
 0x133   :  { %1451 = vperm.xlu0 %1855, %v1547_v30  }
 0x136   :  { %1439 = vperm.xlu1 %1856, %v1544_v27  }
 0x13a   :  { %481 = vperm.xlu1 %1856, %v2022_v9  }
 0x13e   :  { %1447 = vperm.xlu1 %1856, %v1546_v29  }
 0x142   :  { %969 = vperm.xlu1 %1856, %v2103_v41  }
 0x1e9   :  { %v243_v45 = vpop.f32.mrb[0].mxu1 }
 0x1ea   :  { %v244_v46 = vadd.f32 %v243_v45, %v173_v44  ;;  %v1644_v47 = vpop.f32.mrb[1].mxu1 }
 0x1ec   :  { %1859 = vtanh.f32 %v244_v46  ;;  %v620_v46 = vpop.permute.xlu0 %619 }
 0x1f6   :  { %v1860_v53 = vpop.eup %1859 }
 0x1f7   :  { %v276_v55 = vmul.f32 %v1860_v53, %v1860_v53  ;;  %v267_v56 = vrot.slane %v1860_v53, %v2061_v23 }
 0x1f9   :  { %v277_v60 = vsub.f32 1.0, %v276_v55  ;;  %v269_v61 = vmul.f32 %v267_v56, %v254_v49  ;;  %v268_v62 = vmul.f32 %v267_v56, %v250_v50  ;;  %v270_v63 = vmul.f32 %v267_v56, %v258_v54 }
 0x1fa   :  { %v271_v8 = vmul.f32 %v267_v56, %v262_v57 }
 0x1fb   :  { %v279_v13 = vmul.f32 %v278_v59, %v277_v60  ;;  %v2136_v15 = vadd.f32 %v269_v61, %v2068_v33  ;;  %v2139_v16 = vadd.f32 %v268_v62, %v2065_v32  ;;  %v2144_v20 = vadd.f32 %v270_v63, %v2071_v34  ;;  %v362_v32 = vpop.permute.xlu1 %361  ;;  %v635_v60 = vpop.permute.xlu0 %634 }
 0x1fc   :  { %v2147_v21 = vadd.f32 %v271_v8, %v2074_v35  ;;  %v542_v35 = vstv %s1528_s16  ;;  %s1556_s16 = sld [smem:[#allocation2 + $0x102]] }
 0x1fd   :  { %v280_v18 = vadd.f32 1.0, %v279_v13  ;;  %v1768_v19 = vpack.c.bf16 %v2136_v15, %v2139_v16 }
 0x1fe   :  { %v1771_v24 = vpack.c.bf16 %v2147_v21, %v2144_v20 }
 0x1ff   :  { %1769 = vmatpush3.bf16.msra.mxu0 %v1768_v19  ;;  %v2149_v22 = vmul.f32 %v280_v18, %v169_v17  ;;  %v370_v11 = vpop.permute.xlu1 %369  ;;  %v394_v18 = vld [vmem:[%s2458_s2 + $0x3] sm:$0x1]  ;;  %v2263_v31 = vpop.permute.xlu0 %737 }
 0x200   :  { %1770 = vmatprep.subr.bf16.mxu0 %v1941_v3 }
 0x203   :  { %1772 = vmatpush3.bf16.msra.mxu0 %v1771_v24  ;;  %v374_v9 = vpop.permute.xlu1 %373  ;;  %v1531_v24 = vld [vmem:[%s2458_s2 + $0x5] sm:$0x1] }
 0x204   :  { %1779 = vmatprep.subr.bf16.mxu0 %v1941_v3 }
 0x206   :  { %1654 = vmatmul.mubr.msk.f32.vlgmr.msra.gmra.mrb[2].mxu0 %vm58_vm1, %v282_v25 }
 0x207   :  { %1781 = vmatpush3.bf16.msra.mxu0 %v2003_v4  ;;  %1675 = vmatprep.mubr.msk.f32.mxu0 %vm1942_vm0, %v2462_v6  ;;  %v625_v45 = vpop.permute.xlu1 %624 }
 0x208   :  { %1782 = vmatprep.subr.bf16.mxu0 %v1941_v3 }
 0x20b   :  { %1784 = vmatpush3.bf16.msra.mxu0 %v2027_v10  ;;  %v630_v59 = vpop.permute.xlu1 %629 }
 0x20c   :  { %1791 = vmatprep.subr.bf16.mxu0 %v1941_v3 }
 0x20e   :  { %1676 = vmatmul.mubr.msk.f32.vlgmr.msra.gmra.mrb[4].mxu0 %vm58_vm1, %v1523_v26 }
 0x20f   :  { %1697 = vmatprep.mubr.msk.f32.mxu0 %vm1942_vm0, %v2462_v6  ;;  %v2251_v25 = vpop.permute.xlu1 %733 }
 0x213   :  { %v2253_v26 = vpop.permute.xlu1 %741 }
 0x217   :  { %v2255_v27 = vpop.permute.xlu1 %745 }
 0x21b   :  { %v2257_v28 = vpop.permute.xlu1 %849 }
 0x21f   :  { %v2259_v29 = vpop.permute.xlu1 %853 }
 0x223   :  { %v2261_v30 = vpop.permute.xlu1 %1101 }
 0x2d9   :  { %v355_v14 = vpop.f32.mrb[2].mxu0 }
 0x2da   :  { %v356_v33 = vadd.f32 %v355_v14, %v285_v7  ;;  %v1655_v34 = vpop.f32.mrb[3].mxu0  ;;  %v2265_v7 = vpop.permute.xlu1 %1111 }
 0x2db   :  { %v2267_v14 = vpop.permute.xlu0 %845 }
 0x2dc   :  { %1861 = vtanh.f32 %v356_v33 }
 0x2df   :  { %v2271_v33 = vpop.permute.xlu0 %857 }
 0x2e1   :  { %v612_v12 = vpop.f32.mrb[4].mxu0 }
 0x2e2   :  { %v613_v36 = vadd.f32 %v612_v12, %v542_v35  ;;  %v1677_v37 = vpop.f32.mrb[5].mxu0 }
 0x2e4   :  { %1863 = vtanh.f32 %v613_v36 }
 0x2e6   :  { %v1862_v39 = vpop.eup %1861 }
 0x2e7   :  { %v388_v40 = vmul.f32 %v1862_v39, %v1862_v39  ;;  %v379_v41 = vrot.slane %v1862_v39, %v2061_v23 }
 0x2e9   :  { %v389_v43 = vsub.f32 1.0, %v388_v40  ;;  %v380_v44 = vmul.f32 %v379_v41, %v362_v32  ;;  %v382_v47 = vmul.f32 %v379_v41, %v370_v11  ;;  %v383_v48 = vmul.f32 %v379_v41, %v374_v9  ;;  %v2269_v32 = vpop.permute.xlu1 %1116  ;;  %v2275_v11 = vpop.permute.xlu0 %1106 }
 0x2ea   :  { %v381_v49 = vmul.f32 %v379_v41, %v366_v38 }
 0x2eb   :  { %v391_v50 = vmul.f32 %v390_v42, %v389_v43  ;;  %v2197_v51 = vadd.f32 %v380_v44, %v2139_v16  ;;  %v2205_v55 = vadd.f32 %v382_v47, %v2144_v20  ;;  %v2208_v56 = vadd.f32 %v383_v48, %v2147_v21 }
 0x2ec   :  { %v2200_v52 = vadd.f32 %v381_v49, %v2136_v15  ;;  %v397_v43 = vstv %s1520_s22  ;;  %v657_v49 = vstv %s1532_s23 }
 0x2ed   :  { %v392_v53 = vadd.f32 1.0, %v391_v50  ;;  %v1777_v8 = vpack.c.bf16 %v2208_v56, %v2205_v55  ;;  %v2273_v34 = vpop.permute.xlu1 %1219  ;;  %v2279_v12 = vpop.permute.xlu0 %1215 }
 0x2ee   :  { %v2202_v54 = vpop.eup %1863  ;;  %v1774_v57 = vpack.c.bf16 %v2200_v52, %v2197_v51 }
 0x2ef   :  { %v640_v58 = vrot.slane %v2202_v54, %v2061_v23  ;;  %v2215_v61 = vmul.f32 %v392_v53, %v2149_v22 }
 0x2f0   :  { %1775 = vmatpush3.bf16.msra.mxu1 %v1774_v57 }
 0x2f1   :  { %v642_v62 = vmul.f32 %v640_v58, %v625_v45  ;;  %v641_v63 = vmul.f32 %v640_v58, %v620_v46  ;;  %1776 = vmatprep.subr.bf16.mxu1 %v1941_v3  ;;  %v643_v13 = vmul.f32 %v640_v58, %v630_v59  ;;  %v644_v15 = vmul.f32 %v640_v58, %v635_v60  ;;  %v2277_v35 = vpop.permute.xlu1 %1223  ;;  %v2283_v37 = vpop.permute.xlu0 %1227 }
 0x2f3   :  { %v2221_v16 = vadd.f32 %v642_v62, %v1993_v1  ;;  %v2224_v17 = vadd.f32 %v641_v63, %v1988_v0  ;;  %v2233_v20 = vadd.f32 %v643_v13, %v1998_v2  ;;  %v2236_v21 = vadd.f32 %v644_v15, %v2008_v5 }
 0x2f4   :  { %1778 = vmatpush3.bf16.msra.mxu1 %v1777_v8  ;;  %v649_v62 = vmul.f32 %v2202_v54, %v2202_v54 }
 0x2f5   :  { %v1786_v19 = vpack.c.bf16 %v2221_v16, %v2224_v17  ;;  %1785 = vmatprep.subr.bf16.mxu1 %v1941_v3  ;;  %v1789_v22 = vpack.c.bf16 %v2236_v21, %v2233_v20  ;;  %v2281_v36 = vpop.permute.xlu1 %1327  ;;  %v2287_v9 = vpop.permute.xlu0 %1331 }
 0x2f7   :  { %1665 = vmatmul.mubr.msk.f32.vlgmr.msra.gmra.mrb[2].mxu1 %vm58_vm1, %v394_v18  ;;  %v502_v18 = vstv %s1521_s24 }
 0x2f8   :  { %1787 = vmatpush3.bf16.msra.mxu1 %v1786_v19  ;;  %1686 = vmatprep.mubr.msk.f32.mxu1 %vm1942_vm0, %v2462_v6 }
 0x2f9   :  { %1788 = vmatprep.subr.bf16.mxu1 %v1941_v3  ;;  %v2285_v38 = vpop.permute.xlu1 %1335  ;;  %v474_v40 = vpop.permute.xlu0 %473 }
 0x2fc   :  { %1790 = vmatpush3.bf16.msra.mxu1 %v1789_v22 }
 0x2fd   :  { %1797 = vmatprep.subr.bf16.mxu1 %v1941_v3  ;;  %v2289_v39 = vpop.permute.xlu1 %1339  ;;  %v2291_v42 = vpop.permute.xlu0 %961 }
 0x2ff   :  { %1687 = vmatmul.mubr.msk.f32.vlgmr.msra.gmra.mrb[4].mxu1 %vm58_vm1, %v1531_v24 }
 0x300   :  { %1708 = vmatprep.mubr.msk.f32.mxu1 %vm1942_vm0, %v2462_v6 }
 0x301   :  { %v478_v41 = vpop.permute.xlu1 %477  ;;  %v2295_v48 = vpop.permute.xlu0 %1443 }
 0x305   :  { %v2293_v47 = vpop.permute.xlu1 %957  ;;  %v2299_v57 = vpop.permute.xlu0 %965 }
 0x309   :  { %v2297_v50 = vpop.permute.xlu1 %1439  ;;  %v486_v15 = vpop.permute.xlu0 %485 }
 0x30d   :  { %v482_v63 = vpop.permute.xlu1 %481 }
 0x3ca   :  { %v467_v44 = vpop.f32.mrb[2].mxu1 }
 0x3cb   :  { %v468_v45 = vadd.f32 %v467_v44, %v397_v43  ;;  %v1666_v46 = vpop.f32.mrb[3].mxu1  ;;  %v650_v44 = vsub.f32 1.0, %v649_v62 }
 0x3cd   :  { %1865 = vtanh.f32 %v468_v45  ;;  %v651_v45 = vstv %s1529_s25 }
 0x3d2   :  { %v727_v53 = vpop.f32.mrb[4].mxu1 }
 0x3d3   :  { %v728_v58 = vadd.f32 %v727_v53, %v657_v49  ;;  %v1688_v59 = vpop.f32.mrb[5].mxu1 }
 0x3d5   :  { %1867 = vtanh.f32 %v728_v58 }
 0x3d7   :  { %v1866_v60 = vpop.eup %1865 }
 0x3d8   :  { %v500_v8 = vmul.f32 %v1866_v60, %v1866_v60  ;;  %v491_v13 = vrot.slane %v1866_v60, %v2061_v23 }
 0x3da   :  { %v501_v19 = vsub.f32 1.0, %v500_v8  ;;  %v492_v22 = vmul.f32 %v491_v13, %v474_v40  ;;  %v493_v24 = vmul.f32 %v491_v13, %v478_v41  ;;  %v494_v43 = vmul.f32 %v491_v13, %v482_v63 }
 0x3db   :  { %v495_v46 = vmul.f32 %v491_v13, %v486_v15  ;;  %v652_v63 = vmul.f32 %v651_v45, %v650_v44 }
 0x3dc   :  { %v496_v49 = vadd.f32 %v492_v22, %v2197_v51  ;;  %v497_v53 = vadd.f32 %v493_v24, %v2200_v52  ;;  %v498_v54 = vadd.f32 %v494_v43, %v2205_v55  ;;  %v503_v58 = vmul.f32 %v502_v18, %v501_v19 }
 0x3dd   :  { %v499_v59 = vadd.f32 %v495_v46, %v2208_v56  ;;  %v762_v22 = vstv %s2304_s26 }
 0x3de   :  { %v510_v60 = vmul.f32 %v496_v49, %v496_v49  ;;  %v511_v6 = vmul.f32 %v497_v53, %v497_v53  ;;  %v512_v8 = vmul.f32 %v498_v54, %v498_v54  ;;  %v504_v40 = vadd.f32 1.0, %v503_v58 }
 0x3df   :  { %v1868_v41 = vpop.eup %1867  ;;  %v513_v62 = vmul.f32 %v499_v59, %v499_v59  ;;  %v653_v59 = vadd.f32 1.0, %v652_v63 }
 0x3e0   :  { %v515_v13 = vsel %vm514_vm2, %v510_v60, 0.0  ;;  %v516_v51 = vsel %vm514_vm2, %v511_v6, 0.0  ;;  %v751_v52 = vrot.slane %v1868_v41, %v2061_v23  ;;  %v760_v15 = vmul.f32 %v1868_v41, %v1868_v41 }
 0x3e1   :  { %v517_v55 = vadd.f32 %v516_v51, %v515_v13  ;;  %v518_v18 = vsel %vm514_vm2, %v512_v8, 0.0  ;;  %v505_v56 = vmul.f32 %v504_v40, %v2215_v61  ;;  %v520_v53 = vsel %vm514_vm2, %v513_v62, 0.0 }
 0x3e2   :  { %v761_v19 = vsub.f32 1.0, %v760_v15  ;;  %v752_v24 = vmul.f32 %v751_v52, %v2251_v25  ;;  %v753_v43 = vmul.f32 %v751_v52, %v2263_v31  ;;  %v754_v44 = vmul.f32 %v751_v52, %v2253_v26  ;;  %v1543_v15 = vld [vmem:[%s2458_s2 + $0x8] sm:$0x1] }
 0x3e3   :  { %v519_v45 = vadd.f32 %v518_v18, %v517_v55  ;;  %v755_v46 = vmul.f32 %v751_v52, %v2255_v27  ;;  %v506_v6 = vand.u32 2147483647, %v505_v56  ;;  %v769_v18 = vstv %s1536_s29 }
 0x3e4   :  { %v763_v49 = vmul.f32 %v762_v22, %v761_v19  ;;  %v756_v54 = vadd.f32 %v752_v24, %v2224_v17  ;;  %v757_v58 = vadd.f32 %v753_v43, %v2221_v16  ;;  %v758_v31 = vadd.f32 %v754_v44, %v2233_v20  ;;  %v1535_v16 = vld [vmem:[%s2458_s2 + $0x6] sm:$0x1] }
 0x3e5   :  { %v521_v61 = vadd.f32 %v520_v53, %v519_v45  ;;  %v507_v60 = vadd.f32 1e-08, %v506_v6  ;;  %v759_v26 = vadd.f32 %v755_v46, %v2236_v21  ;;  %v2464_v21 = vmov 0.0  }
 0x3e6   :  { %v764_v8 = vadd.f32 1.0, %v763_v49  ;;  %v1792_v25 = vpack.c.bf16 %v757_v58, %v756_v54  ;;  %v1024_v24 = vstv %s1548_s30  ;;  %v874_v53 = vstv %s1537_s6 }
 0x3e7   :  { %v522_v40 = vrot.slane %v521_v61, 4  ;;  %1869 = vlog2.f32 %v507_v60  ;;  %v1795_v62 = vpack.c.bf16 %v759_v26, %v758_v31 }
 0x3e8   :  { %1793 = vmatpush3.bf16.msra.mxu0 %v1792_v25  ;;  %v765_v27 = vmul.f32 %v764_v8, %v653_v59 }
 0x3e9   :  { %v523_v41 = vadd.f32 %v522_v40, %v521_v61  ;;  %1794 = vmatprep.subr.bf16.mxu0 %v1941_v3 }
 0x3eb   :  { %v524_v17 = vrot.slane %v523_v41, 2 }
 0x3ec   :  { %1796 = vmatpush3.bf16.msra.mxu0 %v1795_v62 }
 0x3ed   :  { %v525_v63 = vadd.f32 %v524_v17, %v523_v41  ;;  %1803 = vmatprep.subr.bf16.mxu0 %v1941_v3 }
 0x3ef   :  { %1698 = vmatmul.mubr.msk.f32.vlgmr.msra.gmra.mrb[6].mxu0 %vm58_vm1, %v1535_v16  ;;  %v526_v20 = vrot.slane %v525_v63, 1 }
 0x3f0   :  { %1805 = vmatpush3.bf16.msra.mxu0 %v2003_v4  ;;  %1719 = vmatprep.mubr.msk.f32.mxu0 %vm1942_vm0, %v2464_v21 }
 0x3f1   :  { %1806 = vmatprep.subr.bf16.mxu0 %v1941_v3  ;;  %v527_v13 = vadd.f32 %v526_v20, %v525_v63  ;;  %v1870_v51 = vpop.eup %1869 }
 0x3f2   :  { %v509_v55 = vmul.f32 0.6931472, %v1870_v51 }
 0x3f3   :  { %v528_v52 = vmul.f32 -0.5, %v527_v13 }
 0x3f4   :  { %1808 = vmatpush3.bf16.msra.mxu0 %v2027_v10 }
 0x3f5   :  { %1815 = vmatprep.subr.bf16.mxu0 %v1941_v3  ;;  %v529_v22 = vadd.f32 -29.406033, %v528_v52 }
 0x3f7   :  { %1720 = vmatmul.mubr.msk.f32.vlgmr.msra.gmra.mrb[8].mxu0 %vm58_vm1, %v1543_v15  ;;  %v530_v4 = vadd.f32 %v529_v22, %v509_v55  ;;  %v1139_v15 = vstv %s1552_s12  ;;  %v2394_v22 = vpop.permute.xlu1 %1447 }
 0x3f8   :  { %1741 = vmatprep.mubr.msk.f32.mxu0 %vm1942_vm0, %v2464_v21 }
 0x3f9   :  { %532 = vst.msk [vmem:[#allocation7] sm:$0x1] %vm531_vm3, %v530_v4 }
 0x4c2   :  { %v839_v10 = vpop.f32.mrb[6].mxu0 }
 0x4c3   :  { %v840_v56 = vadd.f32 %v839_v10, %v769_v18  ;;  %v1699_v19 = vpop.f32.mrb[7].mxu0 }
 0x4c5   :  { %1871 = vtanh.f32 %v840_v56 }
 0x4ca   :  { %v1094_v43 = vpop.f32.mrb[8].mxu0 }
 0x4cb   :  { %v1095_v44 = vadd.f32 %v1094_v43, %v1024_v24  ;;  %v1721_v45 = vpop.f32.mrb[9].mxu0  ;;  %v986_v43 = vstv %s1541_s0 }
 0x4cd   :  { %1873 = vtanh.f32 %v1095_v44 }
 0x4cf   :  { %v1872_v46 = vpop.eup %1871 }
 0x4d0   :  { %v863_v6 = vrot.slane %v1872_v46, %v2061_v23  ;;  %v872_v49 = vmul.f32 %v1872_v46, %v1872_v46 }
 0x4d2   :  { %v873_v59 = vsub.f32 1.0, %v872_v49  ;;  %v864_v61 = vmul.f32 %v863_v6, %v2267_v14  ;;  %v865_v60 = vmul.f32 %v863_v6, %v2257_v28  ;;  %v866_v8 = vmul.f32 %v863_v6, %v2259_v29 }
 0x4d3   :  { %v867_v25 = vmul.f32 %v863_v6, %v2271_v33 }
 0x4d4   :  { %v875_v40 = vmul.f32 %v874_v53, %v873_v59  ;;  %v2349_v41 = vadd.f32 %v864_v61, %v756_v54  ;;  %v2351_v62 = vadd.f32 %v865_v60, %v757_v58  ;;  %v870_v63 = vadd.f32 %v866_v8, %v758_v31  ;;  %v1539_v31 = vld [vmem:[%s2458_s2 + $0x7] sm:$0x1] }
 0x4d5   :  { %v871_v20 = vadd.f32 %v867_v25, %v759_v26  ;;  %v1133_v53 = vstv %s1549_s13 }
 0x4d6   :  { %v876_v17 = vadd.f32 1.0, %v875_v40  ;;  %v1798_v16 = vpack.c.bf16 %v2351_v62, %v2349_v41 }
 0x4d7   :  { %v1874_v13 = vpop.eup %1873  ;;  %v1801_v29 = vpack.c.bf16 %v871_v20, %v870_v63 }
 0x4d8   :  { %v1122_v14 = vrot.slane %v1874_v13, %v2061_v23  ;;  %1799 = vmatpush3.bf16.msra.mxu1 %v1798_v16  ;;  %v2356_v28 = vmul.f32 %v876_v17, %v765_v27  ;;  %v1131_v56 = vmul.f32 %v1874_v13, %v1874_v13 }
 0x4d9   :  { %1800 = vmatprep.subr.bf16.mxu1 %v1941_v3 }
 0x4da   :  { %v1123_v33 = vmul.f32 %v1122_v14, %v2261_v30  ;;  %v1124_v54 = vmul.f32 %v1122_v14, %v2275_v11  ;;  %v1125_v58 = vmul.f32 %v1122_v14, %v2265_v7  ;;  %v1126_v51 = vmul.f32 %v1122_v14, %v2269_v32 }
 0x4db   :  { %v1132_v49 = vsub.f32 1.0, %v1131_v56 }
 0x4dc   :  { %1802 = vmatpush3.bf16.msra.mxu1 %v1801_v29  ;;  %v2367_v26 = vadd.f32 %v1123_v33, %v1988_v0  ;;  %v2370_v27 = vadd.f32 %v1124_v54, %v1993_v1  ;;  %v2376_v7 = vadd.f32 %v1125_v58, %v1998_v2  ;;  %v2379_v32 = vadd.f32 %v1126_v51, %v2008_v5  ;;  %v1551_v1 = vld [vmem:[%s2458_s2 + $0x9] sm:$0x1] }
 0x4dd   :  { %1809 = vmatprep.subr.bf16.mxu1 %v1941_v3  ;;  %v881_v2 = vstv %s1540_s11  ;;  %v1134_v29 = vmul.f32 %v1133_v53, %v1132_v49  ;;  %v1244_v58 = vstv %s2397_s14  ;;  %v1251_v49 = vstv %s1556_s16 }
 0x4de   :  { %v1810_v30 = vpack.c.bf16 %v2370_v27, %v2367_v26  ;;  %v1813_v0 = vpack.c.bf16 %v2379_v32, %v2376_v7 }
 0x4df   :  { %1709 = vmatmul.mubr.msk.f32.vlgmr.msra.gmra.mrb[6].mxu1 %vm58_vm1, %v1539_v31 }
 0x4e0   :  { %1811 = vmatpush3.bf16.msra.mxu1 %v1810_v30  ;;  %1730 = vmatprep.mubr.msk.f32.mxu1 %vm1942_vm0, %v2464_v21 }
 0x4e1   :  { %1812 = vmatprep.subr.bf16.mxu1 %v1941_v3 }
 0x4e4   :  { %1814 = vmatpush3.bf16.msra.mxu1 %v1813_v0 }
 0x4e5   :  { %1821 = vmatprep.subr.bf16.mxu1 %v1941_v3 }
 0x4e7   :  { %1731 = vmatmul.mubr.msk.f32.vlgmr.msra.gmra.mrb[8].mxu1 %vm58_vm1, %v1551_v1 }
 0x4e8   :  { %1752 = vmatprep.mubr.msk.f32.mxu1 %vm1942_vm0, %v2464_v21  ;;  %v970_v21 = vpop.permute.xlu1 %969 }
 0x5b2   :  { %v951_v5 = vpop.f32.mrb[6].mxu1 }
 0x5b3   :  { %v952_v11 = vadd.f32 %v951_v5, %v881_v2  ;;  %v1710_v52 = vpop.f32.mrb[7].mxu1 }
 0x5b5   :  { %1875 = vtanh.f32 %v952_v11 }
 0x5ba   :  { %v1209_v55 = vpop.f32.mrb[8].mxu1 }
 0x5bb   :  { %v1210_v4 = vadd.f32 %v1209_v55, %v1139_v15  ;;  %v1732_v18 = vpop.f32.mrb[9].mxu1 }
 0x5bd   :  { %1877 = vtanh.f32 %v1210_v4  ;;  %v1135_v4 = vadd.f32 1.0, %v1134_v29 }
 0x5bf   :  { %v1876_v10 = vpop.eup %1875 }
 0x5c0   :  { %v984_v19 = vmul.f32 %v1876_v10, %v1876_v10  ;;  %v975_v24 = vrot.slane %v1876_v10, %v2061_v23 }
 0x5c2   :  { %v985_v44 = vsub.f32 1.0, %v984_v19  ;;  %v976_v45 = vmul.f32 %v975_v24, %v2293_v47  ;;  %v977_v46 = vmul.f32 %v975_v24, %v2291_v42  ;;  %v978_v6 = vmul.f32 %v975_v24, %v2299_v57 }
 0x5c3   :  { %v979_v59 = vmul.f32 %v975_v24, %v970_v21 }
 0x5c4   :  { %v980_v61 = vadd.f32 %v976_v45, %v2349_v41  ;;  %v981_v60 = vadd.f32 %v977_v46, %v2351_v62  ;;  %v982_v8 = vadd.f32 %v978_v6, %v870_v63  ;;  %v987_v25 = vmul.f32 %v986_v43, %v985_v44 }
 0x5c5   :  { %v983_v40 = vadd.f32 %v979_v59, %v871_v20 }
 0x5c6   :  { %v994_v17 = vmul.f32 %v980_v61, %v980_v61  ;;  %v995_v16 = vmul.f32 %v981_v60, %v981_v60  ;;  %v996_v13 = vmul.f32 %v982_v8, %v982_v8  ;;  %v988_v14 = vadd.f32 1.0, %v987_v25 }
 0x5c7   :  { %v1878_v47 = vpop.eup %1877  ;;  %v997_v42 = vmul.f32 %v983_v40, %v983_v40  ;;  %v1356_v40 = vstv %s1557_s17 }
 0x5c8   :  { %v1233_v57 = vrot.slane %v1878_v47, %v2061_v23  ;;  %v1242_v33 = vmul.f32 %v1878_v47, %v1878_v47  ;;  %v998_v54 = vsel %vm514_vm2, %v994_v17, 0.0  ;;  %v999_v41 = vsel %vm514_vm2, %v995_v16, 0.0 }
 0x5c9   :  { %v1000_v51 = vadd.f32 %v999_v41, %v998_v54  ;;  %v1001_v62 = vsel %vm514_vm2, %v996_v13, 0.0  ;;  %v989_v63 = vmul.f32 %v988_v14, %v2356_v28  ;;  %v1003_v52 = vsel %vm514_vm2, %v997_v42, 0.0 }
 0x5ca   :  { %v1243_v20 = vsub.f32 1.0, %v1242_v33  ;;  %v1234_v31 = vmul.f32 %v1233_v57, %v2279_v12  ;;  %v1235_v30 = vmul.f32 %v1233_v57, %v2273_v34  ;;  %v1236_v0 = vmul.f32 %v1233_v57, %v2277_v35 }
 0x5cb   :  { %v1002_v1 = vadd.f32 %v1001_v62, %v1000_v51  ;;  %v1237_v2 = vmul.f32 %v1233_v57, %v2283_v37  ;;  %v990_v5 = vand.u32 2147483647, %v989_v63 }
 0x5cc   :  { %v1245_v11 = vmul.f32 %v1244_v58, %v1243_v20  ;;  %v1238_v15 = vadd.f32 %v1234_v31, %v2367_v26  ;;  %v1239_v55 = vadd.f32 %v1235_v30, %v2370_v27  ;;  %v1240_v34 = vadd.f32 %v1236_v0, %v2376_v7  ;;  %v1555_v27 = vld [vmem:[%s2458_s2 + $0xa] sm:$0x1]  ;;  %v1452_v0 = vpop.permute.xlu0 %1451 }
 0x5cd   :  { %v1004_v28 = vadd.f32 %v1003_v52, %v1002_v1  ;;  %v991_v18 = vadd.f32 1e-08, %v990_v5  ;;  %v1241_v35 = vadd.f32 %v1237_v2, %v2379_v32 }
 0x5ce   :  { %v1246_v10 = vadd.f32 1.0, %v1245_v11  ;;  %v1816_v12 = vpack.c.bf16 %v1239_v55, %v1238_v15 }
 0x5cf   :  { %v1005_v56 = vrot.slane %v1004_v28, 4  ;;  %1879 = vlog2.f32 %v991_v18  ;;  %v1819_v21 = vpack.c.bf16 %v1241_v35, %v1240_v34 }
 0x5d0   :  { %1817 = vmatpush3.bf16.msra.mxu0 %v1816_v12  ;;  %v1247_v37 = vmul.f32 %v1246_v10, %v1135_v4 }
 0x5d1   :  { %v1006_v19 = vadd.f32 %v1005_v56, %v1004_v28  ;;  %1818 = vmatprep.subr.bf16.mxu0 %v1941_v3 }
 0x5d3   :  { %v1007_v26 = vrot.slane %v1006_v19, 2 }
 0x5d4   :  { %1820 = vmatpush3.bf16.msra.mxu0 %v1819_v21 }
 0x5d5   :  { %v1008_v24 = vadd.f32 %v1007_v26, %v1006_v19 }
 0x5d7   :  { %1742 = vmatmul.mubr.msk.f32.vlgmr.msra.gmra.mrb[10].mxu0 %vm58_vm1, %v1555_v27  ;;  %v1009_v7 = vrot.slane %v1008_v24, 1 }
 0x5d9   :  { %v1010_v43 = vadd.f32 %v1009_v7, %v1008_v24  ;;  %v1880_v32 = vpop.eup %1879 }
 0x5da   :  { %v993_v45 = vmul.f32 0.6931472, %v1880_v32 }
 0x5db   :  { %v1011_v44 = vmul.f32 -0.5, %v1010_v43 }
 0x5dd   :  { %v1012_v46 = vadd.f32 -29.406033, %v1011_v44 }
 0x5df   :  { %v1013_v6 = vadd.f32 %v1012_v46, %v993_v45 }
 0x5e1   :  { %1014 = vst.msk [vmem:[#allocation7 + $0x1] sm:$0x1] %vm531_vm3, %v1013_v6 }
 0x6aa   :  { %v1321_v53 = vpop.f32.mrb[10].mxu0 }
 0x6ab   :  { %v1322_v59 = vadd.f32 %v1321_v53, %v1251_v49  ;;  %v1743_v61 = vpop.f32.mrb[11].mxu0 }
 0x6ad   :  { %1881 = vtanh.f32 %v1322_v59 }
 0x6b7   :  { %v1882_v60 = vpop.eup %1881 }
 0x6b8   :  { %v1345_v8 = vrot.slane %v1882_v60, %v2061_v23  ;;  %v1354_v25 = vmul.f32 %v1882_v60, %v1882_v60 }
 0x6ba   :  { %v1355_v17 = vsub.f32 1.0, %v1354_v25  ;;  %v1346_v16 = vmul.f32 %v1345_v8, %v2281_v36  ;;  %v1347_v13 = vmul.f32 %v1345_v8, %v2287_v9  ;;  %v1348_v14 = vmul.f32 %v1345_v8, %v2285_v38  ;;  %v1559_v36 = vld [vmem:[%s2458_s2 + $0xb] sm:$0x1]  ;;  %s1948_s2 = smov [#allocation7]  }
 0x6bb   :  { %v1349_v47 = vmul.f32 %v1345_v8, %v2289_v39  ;;  %v1363_v38 = vstv %s1560_s20  ;;  %s1503_s22 = sshll.u32 %s1948_s2, 4  ;;  %s1504_s22 = int_to_ptr.vmem [resolvable:$true] %s1503_s22 }
 0x6bc   :  { %v1357_v29 = vmul.f32 %v1356_v40, %v1355_v17  ;;  %v1350_v42 = vadd.f32 %v1346_v16, %v1238_v15  ;;  %v1351_v57 = vadd.f32 %v1347_v13, %v1239_v55  ;;  %v1352_v41 = vadd.f32 %v1348_v14, %v1240_v34  ;;  %s1911_s23 = scalar_lea.vmem %s1504_s22, 64  ;;  %p1916_p11 = scmp.lt.s32.totalorder %s1504_s22, %s1504_s22 }
 0x6bd   :  { %v1353_v58 = vadd.f32 %v1349_v47, %v1241_v35  ;;  %p1912_p10 = scmp.ne.s32.totalorder %s1504_s22, %s1911_s23  ;;  %p1917_p12 = scmp.lt.s32.totalorder %s1911_s23, %s1911_s23 }
 0x6be   :  { %v1358_v33 = vadd.f32 1.0, %v1357_v29  ;;  %v1822_v54 = vpack.c.bf16 %v1351_v57, %v1350_v42 }
 0x6bf   :  { %v1825_v62 = vpack.c.bf16 %v1353_v58, %v1352_v41  ;;  %p1918_p13 = por %p1917_p12, %p1916_p11 }
 0x6c0   :  { %1823 = vmatpush3.bf16.msra.mxu1 %v1822_v54  ;;  %v1359_v51 = vmul.f32 %v1358_v33, %v1247_v37 }
 0x6c1   :  { %1824 = vmatprep.subr.bf16.mxu1 %v1941_v3  ;;  %v1468_v3 = vstv %s1561_s21  ;;  %p1919_p0 = pnand %p1918_p13, %p1912_p10 }
 0x6c4   :  { %1826 = vmatpush3.bf16.msra.mxu1 %v1825_v62 }
 0x6c7   :  { %1753 = vmatmul.mubr.msk.f32.vlgmr.msra.gmra.mrb[10].mxu1 %vm58_vm1, %v1559_v36 }
 0x79a   :  { %v1433_v9 = vpop.f32.mrb[10].mxu1 }
 0x79b   :  { %v1434_v39 = vadd.f32 %v1433_v9, %v1363_v38  ;;  %v1754_v63 = vpop.f32.mrb[11].mxu1 }
 0x79d   :  { %1883 = vtanh.f32 %v1434_v39 }
 0x7a7   :  { %v1884_v20 = vpop.eup %1883 }
 0x7a8   :  { %v1457_v31 = vrot.slane %v1884_v20, %v2061_v23  ;;  %v1466_v30 = vmul.f32 %v1884_v20, %v1884_v20 }
 0x7aa   :  { %v1458_v1 = vmul.f32 %v1457_v31, %v2297_v50  ;;  %v1459_v2 = vmul.f32 %v1457_v31, %v2295_v48  ;;  %v1460_v5 = vmul.f32 %v1457_v31, %v2394_v22  ;;  %v1467_v11 = vsub.f32 1.0, %v1466_v30 }
 0x7ab   :  { %v1461_v52 = vmul.f32 %v1457_v31, %v1452_v0 }
 0x7ac   :  { %v1462_v15 = vadd.f32 %v1458_v1, %v1350_v42  ;;  %v1463_v55 = vadd.f32 %v1459_v2, %v1351_v57  ;;  %v1464_v4 = vadd.f32 %v1460_v5, %v1352_v41  ;;  %v1469_v28 = vmul.f32 %v1468_v3, %v1467_v11 }
 0x7ad   :  { %v1465_v18 = vadd.f32 %v1461_v52, %v1353_v58 }
 0x7ae   :  { %v1470_v10 = vadd.f32 1.0, %v1469_v28  ;;  %v1476_v12 = vmul.f32 %v1462_v15, %v1462_v15  ;;  %v1477_v34 = vmul.f32 %v1463_v55, %v1463_v55  ;;  %v1478_v23 = vmul.f32 %v1464_v4, %v1464_v4 }
 0x7af   :  { %v1479_v56 = vmul.f32 %v1465_v18, %v1465_v18 }
 0x7b0   :  { %v1471_v35 = vmul.f32 %v1470_v10, %v1359_v51  ;;  %v1480_v37 = vsel %vm514_vm2, %v1476_v12, 0.0  ;;  %v1481_v50 = vsel %vm514_vm2, %v1477_v34, 0.0  ;;  %v1483_v22 = vsel %vm514_vm2, %v1478_v23, 0.0 }
 0x7b1   :  { %v1482_v48 = vadd.f32 %v1481_v50, %v1480_v37  ;;  %v1485_v27 = vsel %vm514_vm2, %v1479_v56, 0.0 }
 0x7b2   :  { %v1472_v19 = vand.u32 2147483647, %v1471_v35 }
 0x7b3   :  { %v1484_v21 = vadd.f32 %v1483_v22, %v1482_v48 }
 0x7b4   :  { %v1473_v26 = vadd.f32 1e-08, %v1472_v19 }
 0x7b5   :  { %v1486_v24 = vadd.f32 %v1485_v27, %v1484_v21 }
 0x7b6   :  { %1885 = vlog2.f32 %v1473_v26 }
 0x7b7   :  { %v1487_v7 = vrot.slane %v1486_v24, 4 }
 0x7b9   :  { %v1488_v43 = vadd.f32 %v1487_v7, %v1486_v24 }
 0x7bb   :  { %v1489_v32 = vrot.slane %v1488_v43, 2 }
 0x7bd   :  { %v1490_v44 = vadd.f32 %v1489_v32, %v1488_v43 }
 0x7bf   :  { %v1491_v45 = vrot.slane %v1490_v44, 1 }
 0x7c0   :  { %v1886_v6 = vpop.eup %1885 }
 0x7c1   :  { %v1492_v46 = vadd.f32 %v1491_v45, %v1490_v44  ;;  %v1475_v53 = vmul.f32 0.6931472, %v1886_v6 }
 0x7c3   :  { %v1493_v49 = vmul.f32 -0.5, %v1492_v46 }
 0x7c5   :  { %v1494_v59 = vadd.f32 -29.406033, %v1493_v49 }
 0x7c7   :  { %v1495_v61 = vadd.f32 %v1494_v59, %v1475_v53 }
 0x7c9   :  { %1496 = vst.msk [vmem:[#allocation7 + $0x2] sm:$0x1] %vm531_vm3, %v1495_v61 }
 0x7ca   :  { %1922 = shalt.err (!%p1919_p0)
}
 0x7cb   :  { %s1923_s26 = scalar_lea.hbm %s2461_s5, 64 }
 0x7cc   :  { %p1924_p1 = scmp.ne.s32.totalorder %s2461_s5, %s1923_s26  ;;  %p1927_p2 = scmp.lt.u32.totalorder %s1923_s26, %s2461_s5 }
 0x7ce   :  { %p1929_p3 = pnand %p1927_p2, %p1924_p1 }
 0x7d0   :  { %1932 = shalt.err (!%p1929_p3)
}
 0x7d1   :  { %1506 = dma.vmem_to_hbm [thread:$0]  %s1504_s22, 64, %s2461_s5, [#allocation3]  }
 0x7d2   :  { %1937 = dma.done.wait [#allocation3], 64  }
 0x7d3   :  { %1938 = vsyncadd [#allocation3], 4294967232 }
 0x7d4   :  { %1510 = vsyncpa [#allocation3], 1 }
 0x7d5   :  { %1511 = vsyncpa [#allocation4], 1 }
 0x7d6   :  { %1512 = vsyncpa [#allocation6], 1 }

</bundles_post_ra>
